<compile_context>
chip_gen: v5e
topology: v5e:2x2
jax: 0.10.0
libtpu: 0.0.40
codegen_flags: <defaults>
</compile_context>

<pallas_src>
import functools

import numpy as np
import jax
import jax.numpy as jnp
from jax.experimental import pallas as pl
from jax.experimental.pallas import tpu as pltpu


# ----------------------------------------------------------------------------
# Fused Pallas kernel
# ----------------------------------------------------------------------------
def _tree_gnn_kernel(
    var_x_ref, node_x_ref,
    var_g_ref, var_b_ref, var_w_ref, var_bias_ref,
    tree_g_ref, tree_b_ref, tree_w_ref, tree_bias_ref,
    glob_w_ref, glob_bias_ref,
    glb_rows_ref, glb_mask_ref,
    adj_ref,
    w1_ref, asrc1_ref, adst1_ref, bias1_ref,
    w2_ref, asrc2_ref, adst2_ref, bias2_ref,
    dst_ref, src_ref,
    glb_out_ref, alpha_out_ref,
    *, heads, hidden, n_tree):
    """Fused TreeGNN forward (eval mode).

    N = n_tree + batch, C = hidden, E = #edges (incl. self loops).
      var_x (N,25) f32   node_x (N,F) f32   adj (N,N) int8
      glb_rows (N,C)     glb_mask (N,1)
      var_w (25,C) bf16  tree_w (F,C) bf16  glob_w (2C,C) bf16
      w1 (C, heads*C) bf16 (packed heads)   w2 (heads*C, C) bf16
      asrc1/adst1/bias1 (heads,1,C) f32     asrc2/adst2/bias2 (1,C) f32
      dst/src (E,1) int32
      outputs: glb_out (batch,C) f32, alpha_out (E,1) f32
    """
    f32 = jnp.float32
    bf16 = jnp.bfloat16
    eps = f32(1e-5)
    neg_slope = f32(0.2)
    neg_big = f32(-1e30)

    C = hidden
    N = adj_ref.shape[0]
    batch = glb_out_ref.shape[0]
    E = dst_ref.shape[0]

    # int8 adjacency: DMA / VMEM residency stays int8; widen once for the mask.
    adj_f = adj_ref[...].astype(f32)                    # (N, N)
    mask = adj_f > f32(0.0)

    def layer_norm(x, g, b):
        mu = jnp.mean(x, axis=-1, keepdims=True)
        var = jnp.mean(jnp.square(x - mu), axis=-1, keepdims=True)
        return (x - mu) * jax.lax.rsqrt(var + eps) * g + b

    def leaky(x):
        return jnp.where(x > 0, x, x * neg_slope)

    # ---- embeddings: LN+Linear (var), LN+Linear (tree), global Linear -------
    var_e = (jnp.dot(layer_norm(var_x_ref[...], var_g_ref[...],
                                var_b_ref[...]).astype(bf16),
                     var_w_ref[...], preferred_element_type=f32)
             + var_bias_ref[...])
    tree_e = (jnp.dot(layer_norm(node_x_ref[...], tree_g_ref[...],
                                 tree_b_ref[...]).astype(bf16),
                      tree_w_ref[...], preferred_element_type=f32)
              + tree_bias_ref[...])
    # global_embedding(cat([var, tree])) == var @ W[:C] + tree @ W[C:] + b
    # (aligned row-block slices of glob_w, no in-kernel concat)
    x0 = (jnp.dot(var_e.astype(bf16), glob_w_ref[0:C, :],
                  preferred_element_type=f32)
          + jnp.dot(tree_e.astype(bf16), glob_w_ref[C:2 * C, :],
                    preferred_element_type=f32)
          + glob_bias_ref[...])
    # overwrite the global-node rows with the learnable glbNode embedding
    x = x0 * (f32(1.0) - glb_mask_ref[...]) + glb_rows_ref[...]          # (N, C)

    # ---- GAT1: both heads' projection in ONE packed bf16 matmul -------------
    xh1_all = jnp.dot(x.astype(bf16), w1_ref[...],
                      preferred_element_type=f32)                        # (N, heads*C)

    # per-head attention + GAT2 input projection (head-block split of W2)
    xh2 = jnp.zeros((N, C), f32)
    for h in range(heads):                                # static -> unrolled
        xh1_h = xh1_all[:, h * C:(h + 1) * C]             # in-vreg lane slice
        a_dst = jnp.sum(xh1_h * adst1_ref[h], axis=-1, keepdims=True)    # (N,1)
        a_src_row = jax.lax.dot_general(
            asrc1_ref[h], xh1_h, (((1,), (1,)), ((), ())),
            preferred_element_type=f32)                                  # (1,N)
        e = jnp.where(mask, leaky(a_dst + a_src_row), neg_big)           # (N,N)
        m = jnp.max(e, axis=-1, keepdims=True)
        p = jnp.where(mask, jnp.exp(e - m), f32(0.0))
        inv_l = pl.reciprocal(jnp.sum(p, axis=-1, keepdims=True), approx=True)
        alpha1 = p * inv_l                                               # (N,N)
        h1_h = jnp.maximum(
            jnp.dot(alpha1.astype(bf16), xh1_h.astype(bf16),
                    preferred_element_type=f32) + bias1_ref[h],
            f32(0.0))                                                    # (N,C)
        xh2 = xh2 + jnp.dot(h1_h.astype(bf16), w2_ref[h * C:(h + 1) * C, :],
                            preferred_element_type=f32)                  # (N,C)

    # ---- GAT2 (single head): keep softmax STATISTICS only -------------------
    a_dst2 = jnp.sum(xh2 * adst2_ref[...], axis=-1, keepdims=True)       # (N,1)
    a_src2_col = jnp.sum(xh2 * asrc2_ref[...], axis=-1, keepdims=True)   # (N,1)
    a_src2_row = jax.lax.dot_general(
        asrc2_ref[...], xh2, (((1,), (1,)), ((), ())),
        preferred_element_type=f32)                                      # (1,N)
    e2 = jnp.where(mask, leaky(a_dst2 + a_src2_row), neg_big)            # (N,N)
    m2 = jnp.max(e2, axis=-1, keepdims=True)                             # (N,1)
    p2 = jnp.where(mask, jnp.exp(e2 - m2), f32(0.0))                     # (N,N)
    inv_l2 = pl.reciprocal(jnp.sum(p2, axis=-1, keepdims=True), approx=True)

    # Only the global-node rows are normalized / matmul'ed (exact one-hot row
    # selection in f32 — avoids the full N^2 normalization and any unaligned
    # sublane slice of p2).
    r_iota = jax.lax.broadcasted_iota(jnp.int32, (batch, N), 0)
    c_iota = jax.lax.broadcasted_iota(jnp.int32, (batch, N), 1)
    glb_sel = (c_iota == r_iota + n_tree).astype(f32)                    # (batch,N)
    glb_p = jnp.dot(glb_sel, p2, preferred_element_type=f32)             # (batch,N)
    glb_inv_l = jnp.dot(glb_sel, inv_l2, preferred_element_type=f32)     # (batch,1)
    glb_out_ref[...] = (jnp.dot(glb_p * glb_inv_l, xh2,
                                preferred_element_type=f32)
                        + bias2_ref[...])                                # (batch,C)

    # Per-edge attention from softmax stats: alpha[e] =
    #   exp(leakyrelu(a_dst2[dst] + a_src2[src]) - m2[dst]) * inv_l2[dst]
    # Four (E,N)x(N,1) exact f32 gathers — O(E*N), no (E,N)x(N,N) matmul and
    # no (E,N) intermediate kept past the gather.
    ecol = jax.lax.broadcasted_iota(jnp.int32, (E, N), 1)
    oh_dst = (ecol == dst_ref[...]).astype(f32)                          # (E,N)
    oh_src = (ecol == src_ref[...]).astype(f32)                          # (E,N)
    ad_g = jnp.dot(oh_dst, a_dst2, preferred_element_type=f32)           # (E,1)
    m_g = jnp.dot(oh_dst, m2, preferred_element_type=f32)                # (E,1)
    il_g = jnp.dot(oh_dst, inv_l2, preferred_element_type=f32)           # (E,1)
    as_g = jnp.dot(oh_src, a_src2_col, preferred_element_type=f32)       # (E,1)
    alpha_out_ref[...] = jnp.exp(leaky(ad_g + as_g) - m_g) * il_g


# ----------------------------------------------------------------------------
# Jitted wrapper around the single pallas_call
# ----------------------------------------------------------------------------
def _vmem_limit_bytes():
    # Explicit scoped-VMEM budget (defaults are only 16/32 MiB): leave headroom
    # — <= ~56 MiB on v7x (64 MiB physical), <= ~100 MiB on v5e/v6e (128 MiB).
    try:
        cap = int(pltpu.get_tpu_info().vmem_capacity_bytes)
    except Exception:
        cap = 64 * 1024 * 1024
    return min(cap * 7 // 8, 100 * 1024 * 1024)


@functools.partial(jax.jit,
                   static_argnames=("hidden", "heads", "n_tree", "batch"))
def _fused_forward(params, tree_feature, adj, dst_idx, src_idx,
                   *, hidden, heads, n_tree, batch):
    H = hidden
    f32 = jnp.float32
    bf16 = jnp.bfloat16

    var_x = tree_feature[:, -25:]
    node_x = tree_feature[:, :-25]
    feat = node_x.shape[1]
    N = n_tree + batch
    E = dst_idx.shape[0]

    # pad rows for the batch global nodes (they bypass the embeddings; padded
    # rows are masked out in-kernel via glb_mask BEFORE any further use)
    var_x = jnp.concatenate([var_x, jnp.zeros((batch, 25), f32)], axis=0)
    node_x = jnp.concatenate([node_x, jnp.zeros((batch, feat), f32)], axis=0)
    glb_rows = jnp.concatenate(
        [jnp.zeros((n_tree, H), f32),
         jnp.broadcast_to(params["glbNode"][None, :], (batch, H))], axis=0)
    glb_mask = jnp.concatenate(
        [jnp.zeros((n_tree, 1), f32), jnp.ones((batch, 1), f32)], axis=0)

    # bf16 weights for the MXU (halves weight DMA bytes; f32 accumulation in
    # the kernel).  Natural (in, out) layouts — no reshapes / transposes.
    var_w = params["var_w"].astype(bf16)                       # (25, H)
    tree_w = params["tree_w"].astype(bf16)                     # (F, H)
    glob_w = params["glob_w"].astype(bf16)                     # (2H, H)
    w1 = params["gat1_w"].astype(bf16)                         # (H, heads*H) packed
    w2 = params["gat2_w"].astype(bf16)                         # (heads*H, H)

    asrc1 = params["gat1_asrc"].reshape(heads, 1, H)
    adst1 = params["gat1_adst"].reshape(heads, 1, H)
    bias1 = params["gat1_b"].reshape(heads, 1, H)

    operands = (
        var_x, node_x,
        params["var_ln_g"].reshape(1, -1), params["var_ln_b"].reshape(1, -1),
        var_w, params["var_b"].reshape(1, -1),
        params["tree_ln_g"].reshape(1, -1), params["tree_ln_b"].reshape(1, -1),
        tree_w, params["tree_b"].reshape(1, -1),
        glob_w, params["glob_b"].reshape(1, -1),
        glb_rows, glb_mask,
        adj,
        w1, asrc1, adst1, bias1,
        w2, params["gat2_asrc"].reshape(1, H), params["gat2_adst"].reshape(1, H),
        params["gat2_b"].reshape(1, H),
        dst_idx, src_idx,
    )

    # Advisory cost estimate for XLA's scheduler.
    flops = int(
        2 * N * (25 + feat + 2 * H) * H              # embeddings
        + 2 * N * H * (heads * H)                    # packed GAT1 projection
        + heads * (2 * N * H + 2 * N * N * H)        # score rows + alpha1 @ xh1
        + 2 * N * (heads * H) * H                    # GAT2 input projection
        + 2 * batch * N * (N + H)                    # global rows of alpha2 @ xh2
        + 8 * E * N)                                 # per-edge stat gathers
    transcendentals = int((heads + 1) * N * N + E)
    bytes_accessed = int(
        sum(int(np.prod(a.shape)) * a.dtype.itemsize for a in operands)
        + batch * H * 4 + E * 4)

    vmem_spec = pl.BlockSpec(memory_space=pltpu.MemorySpace.VMEM)
    kernel = functools.partial(_tree_gnn_kernel, heads=heads, hidden=H,
                               n_tree=n_tree)

    # Single block: every operand lives whole in VMEM (tiny problem sizes).
    glb_out, alpha = pl.pallas_call(
        kernel,
        out_shape=(jax.ShapeDtypeStruct((batch, H), f32),
                   jax.ShapeDtypeStruct((E, 1), f32)),
        in_specs=[vmem_spec] * len(operands),
        out_specs=(vmem_spec, vmem_spec),
        compiler_params=pltpu.CompilerParams(
            vmem_limit_bytes=_vmem_limit_bytes()),
        cost_estimate=pl.CostEstimate(flops=flops,
                                      transcendentals=transcendentals,
                                      bytes_accessed=bytes_accessed),
    )(*operands)
    return glb_out, alpha


# ----------------------------------------------------------------------------
# Graph preprocessing (host, once per topology — off the per-call hot path)
# ----------------------------------------------------------------------------
def prepare_graph(edge_index, num_tree_nodes, ptr):
    batch = len(num_tree_nodes)
    n_tree = int(np.sum(np.asarray(num_tree_nodes)))
    n_total = n_tree + batch

    # global-node <-> tree-node edges (mirrors the torch.no_grad() loop)
    glb_src, glb_dst = [], []
    for i in range(batch):
        g = n_tree + i
        rng = list(range(int(ptr[i]), int(ptr[i + 1])))
        glb_src += [g] * len(rng) + rng
        glb_dst += rng + [g] * len(rng)
    glb_edges = np.stack([np.asarray(glb_src, np.int64),
                          np.asarray(glb_dst, np.int64)], axis=0)
    full_edges = np.concatenate([np.asarray(edge_index, np.int64), glb_edges],
                                axis=1)

    # GATConv(add_self_loops=True): strip existing self loops, append new ones
    keep = full_edges[0] != full_edges[1]
    full_edges = full_edges[:, keep]
    self_loops = np.stack([np.arange(n_total), np.arange(n_total)], axis=0)
    ret_edge_index = np.concatenate([full_edges, self_loops], axis=1)

    # dense adjacency as int8 (values are 0/1): 4x fewer HBM/VMEM bytes
    adj = np.zeros((n_total, n_total), np.int8)
    adj[ret_edge_index[1], ret_edge_index[0]] = 1        # adj[dst, src]
    assert np.all(np.diag(adj) == 1), "self loops required (softmax guard)"

    return {
        "adj": jnp.asarray(adj),
        "dst_idx": jnp.asarray(ret_edge_index[1].astype(np.int32)[:, None]),
        "src_idx": jnp.asarray(ret_edge_index[0].astype(np.int32)[:, None]),
        "ret_edge_index": jnp.asarray(ret_edge_index),
        "n_tree": n_tree,
        "batch": batch,
    }


def tree_gnn_forward(params, tree_feature, graph, *, hidden_size, heads):
    tree_glb, alpha = _fused_forward(
        params, tree_feature, graph["adj"], graph["dst_idx"], graph["src_idx"],
        hidden=hidden_size, heads=heads,
        n_tree=graph["n_tree"], batch=graph["batch"])
    return tree_glb, (graph["ret_edge_index"], alpha)


# ----------------------------------------------------------------------------
# Parameters (deterministic synthetic init; matches module shapes)
# ----------------------------------------------------------------------------
def init_params(key, feat_size, hidden_size, heads):
    ks = jax.random.split(key, 13)

    def lin_w(k, fan_in, fan_out):
        return (jax.random.normal(k, (fan_in, fan_out), jnp.float32)
                * (1.0 / np.sqrt(fan_in)))

    return {
        "var_ln_g": jnp.ones((25,), jnp.float32),
        "var_ln_b": jnp.zeros((25,), jnp.float32),
        "var_w": lin_w(ks[0], 25, hidden_size),
        "var_b": 0.01 * jax.random.normal(ks[1], (hidden_size,), jnp.float32),
        "tree_ln_g": jnp.ones((feat_size,), jnp.float32),
        "tree_ln_b": jnp.zeros((feat_size,), jnp.float32),
        "tree_w": lin_w(ks[2], feat_size, hidden_size),
        "tree_b": 0.01 * jax.random.normal(ks[3], (hidden_size,), jnp.float32),
        "glob_w": lin_w(ks[4], 2 * hidden_size, hidden_size),
        "glob_b": 0.01 * jax.random.normal(ks[5], (hidden_size,), jnp.float32),
        "gat1_w": lin_w(ks[6], hidden_size, heads * hidden_size),
        "gat1_asrc": 0.1 * jax.random.normal(ks[7], (heads, hidden_size), jnp.float32),
        "gat1_adst": 0.1 * jax.random.normal(ks[8], (heads, hidden_size), jnp.float32),
        "gat1_b": jnp.zeros((heads * hidden_size,), jnp.float32),
        "gat2_w": lin_w(ks[9], heads * hidden_size, hidden_size),
        "gat2_asrc": 0.1 * jax.random.normal(ks[10], (1, hidden_size), jnp.float32),
        "gat2_adst": 0.1 * jax.random.normal(ks[11], (1, hidden_size), jnp.float32),
        "gat2_b": jnp.zeros((hidden_size,), jnp.float32),
        "glbNode": jax.random.normal(ks[12], (hidden_size,), jnp.float32),
    }


# ----------------------------------------------------------------------------
# main
# ----------------------------------------------------------------------------
if __name__ == "__main__":
    feat_size, hidden_size, heads = 16, 32, 2
    key = jax.random.PRNGKey(0)
    pkey, xkey = jax.random.split(key)
    params = init_params(pkey, feat_size, hidden_size, heads)

    # two small trees, 4 nodes each
    num_tree_nodes = [4, 4]
    ptr = [0, 4, 8]
    n_nodes = 8
    tree_feature = jax.random.normal(xkey, (n_nodes, feat_size + 25),
                                     jnp.float32)
    edges = []
    for base in (0, 4):
        for a, b in ((0, 1), (1, 2), (2, 3)):
            edges.append((base + a, base + b))
            edges.append((base + b, base + a))
    edge_index = np.array(edges, dtype=np.int64).T      # (2, num_edge)

    graph = prepare_graph(edge_index, num_tree_nodes, ptr)   # once per topology
    tree_glb, (ret_ei, alpha) = tree_gnn_forward(
        params, tree_feature, graph, hidden_size=hidden_size, heads=heads)
    jax.block_until_ready((tree_glb, alpha))

    assert tree_glb.shape == (len(num_tree_nodes), hidden_size)
    assert alpha.shape == (ret_ei.shape[1], 1)
    assert bool(jnp.all(jnp.isfinite(tree_glb))) and bool(jnp.all(jnp.isfinite(alpha)))
    print("KERNEL_OK")
</pallas_src>

<mosaic_0001>
module attributes {stable_mosaic.version = 11 : i64} {
  func.func @_tree_gnn_kernel(%arg0: memref<10x25xf32, #tpu.memory_space<vmem>>, %arg1: memref<10x16xf32, #tpu.memory_space<vmem>>, %arg2: memref<1x25xf32, #tpu.memory_space<vmem>>, %arg3: memref<1x25xf32, #tpu.memory_space<vmem>>, %arg4: memref<25x32xbf16, #tpu.memory_space<vmem>>, %arg5: memref<1x32xf32, #tpu.memory_space<vmem>>, %arg6: memref<1x16xf32, #tpu.memory_space<vmem>>, %arg7: memref<1x16xf32, #tpu.memory_space<vmem>>, %arg8: memref<16x32xbf16, #tpu.memory_space<vmem>>, %arg9: memref<1x32xf32, #tpu.memory_space<vmem>>, %arg10: memref<64x32xbf16, #tpu.memory_space<vmem>>, %arg11: memref<1x32xf32, #tpu.memory_space<vmem>>, %arg12: memref<10x32xf32, #tpu.memory_space<vmem>>, %arg13: memref<10x1xf32, #tpu.memory_space<vmem>>, %arg14: memref<10x10xi8, #tpu.memory_space<vmem>>, %arg15: memref<32x64xbf16, #tpu.memory_space<vmem>>, %arg16: memref<2x1x32xf32, #tpu.memory_space<vmem>>, %arg17: memref<2x1x32xf32, #tpu.memory_space<vmem>>, %arg18: memref<2x1x32xf32, #tpu.memory_space<vmem>>, %arg19: memref<64x32xbf16, #tpu.memory_space<vmem>>, %arg20: memref<1x32xf32, #tpu.memory_space<vmem>>, %arg21: memref<1x32xf32, #tpu.memory_space<vmem>>, %arg22: memref<1x32xf32, #tpu.memory_space<vmem>>, %arg23: memref<38x1xi32, #tpu.memory_space<vmem>>, %arg24: memref<38x1xi32, #tpu.memory_space<vmem>>, %arg25: memref<2x32xf32, #tpu.memory_space<vmem>>, %arg26: memref<38x1xf32, #tpu.memory_space<vmem>>) attributes {dimension_semantics = [], scalar_prefetch = 0 : i64, scratch_operands = 0 : i64, tpu.core_type = #tpu.core_type<tc>} {
    %c0 = arith.constant 0 : index
    %c0_0 = arith.constant 0 : index
    %0 = vector.load %arg14[%c0, %c0_0] : memref<10x10xi8, #tpu.memory_space<vmem>>, vector<10x10xi8>
    %1 = arith.sitofp %0 : vector<10x10xi8> to vector<10x10xf32>
    %cst = arith.constant 0.000000e+00 : f32
    %2 = vector.broadcast %cst : f32 to vector<10x10xf32>
    %3 = arith.cmpf ogt, %1, %2 : vector<10x10xf32>
    %c0_1 = arith.constant 0 : index
    %c0_2 = arith.constant 0 : index
    %4 = vector.load %arg0[%c0_1, %c0_2] : memref<10x25xf32, #tpu.memory_space<vmem>>, vector<10x25xf32>
    %c0_3 = arith.constant 0 : index
    %c0_4 = arith.constant 0 : index
    %5 = vector.load %arg2[%c0_3, %c0_4] : memref<1x25xf32, #tpu.memory_space<vmem>>, vector<1x25xf32>
    %c0_5 = arith.constant 0 : index
    %c0_6 = arith.constant 0 : index
    %6 = vector.load %arg3[%c0_5, %c0_6] : memref<1x25xf32, #tpu.memory_space<vmem>>, vector<1x25xf32>
    %cst_7 = arith.constant dense<0.000000e+00> : vector<10xf32>
    %7 = vector.multi_reduction <add>, %4, %cst_7 [1] : vector<10x25xf32> to vector<10xf32>
    %8 = vector.shape_cast %7 : vector<10xf32> to vector<10x1xf32>
    %cst_8 = arith.constant 2.500000e+01 : f32
    %9 = vector.broadcast %cst_8 : f32 to vector<10x1xf32>
    %10 = arith.divf %8, %9 : vector<10x1xf32>
    %11 = vector.broadcast %10 : vector<10x1xf32> to vector<10x25xf32>
    %12 = arith.subf %4, %11 : vector<10x25xf32>
    %13 = arith.mulf %12, %12 : vector<10x25xf32>
    %cst_9 = arith.constant dense<0.000000e+00> : vector<10xf32>
    %14 = vector.multi_reduction <add>, %13, %cst_9 [1] : vector<10x25xf32> to vector<10xf32>
    %15 = vector.shape_cast %14 : vector<10xf32> to vector<10x1xf32>
    %cst_10 = arith.constant 2.500000e+01 : f32
    %16 = vector.broadcast %cst_10 : f32 to vector<10x1xf32>
    %17 = arith.divf %15, %16 : vector<10x1xf32>
    %18 = vector.broadcast %10 : vector<10x1xf32> to vector<10x25xf32>
    %19 = arith.subf %4, %18 : vector<10x25xf32>
    %cst_11 = arith.constant 9.99999974E-6 : f32
    %20 = vector.broadcast %cst_11 : f32 to vector<10x1xf32>
    %21 = arith.addf %17, %20 : vector<10x1xf32>
    %22 = math.rsqrt %21 : vector<10x1xf32>
    %23 = vector.broadcast %22 : vector<10x1xf32> to vector<10x25xf32>
    %24 = arith.mulf %19, %23 : vector<10x25xf32>
    %25 = vector.broadcast %5 : vector<1x25xf32> to vector<10x25xf32>
    %26 = arith.mulf %24, %25 : vector<10x25xf32>
    %27 = vector.broadcast %6 : vector<1x25xf32> to vector<10x25xf32>
    %28 = arith.addf %26, %27 : vector<10x25xf32>
    %29 = arith.truncf %28 : vector<10x25xf32> to vector<10x25xbf16>
    %c0_12 = arith.constant 0 : index
    %c0_13 = arith.constant 0 : index
    %30 = vector.load %arg4[%c0_12, %c0_13] : memref<25x32xbf16, #tpu.memory_space<vmem>>, vector<25x32xbf16>
    %cst_14 = arith.constant dense<0.000000e+00> : vector<10x32xf32>
    %31 = tpu.matmul %29, %30, %cst_14 {dimension_numbers = #tpu.dot_dimension_numbers<[1], [0], [0], [1], [0, 0, 1, 1], [], []>} : vector<10x25xbf16>, vector<25x32xbf16>, vector<10x32xf32> -> vector<10x32xf32>
    %c0_15 = arith.constant 0 : index
    %c0_16 = arith.constant 0 : index
    %32 = vector.load %arg5[%c0_15, %c0_16] : memref<1x32xf32, #tpu.memory_space<vmem>>, vector<1x32xf32>
    %33 = vector.broadcast %32 : vector<1x32xf32> to vector<10x32xf32>
    %34 = arith.addf %31, %33 : vector<10x32xf32>
    %c0_17 = arith.constant 0 : index
    %c0_18 = arith.constant 0 : index
    %35 = vector.load %arg1[%c0_17, %c0_18] : memref<10x16xf32, #tpu.memory_space<vmem>>, vector<10x16xf32>
    %c0_19 = arith.constant 0 : index
    %c0_20 = arith.constant 0 : index
    %36 = vector.load %arg6[%c0_19, %c0_20] : memref<1x16xf32, #tpu.memory_space<vmem>>, vector<1x16xf32>
    %c0_21 = arith.constant 0 : index
    %c0_22 = arith.constant 0 : index
    %37 = vector.load %arg7[%c0_21, %c0_22] : memref<1x16xf32, #tpu.memory_space<vmem>>, vector<1x16xf32>
    %cst_23 = arith.constant dense<0.000000e+00> : vector<10xf32>
    %38 = vector.multi_reduction <add>, %35, %cst_23 [1] : vector<10x16xf32> to vector<10xf32>
    %39 = vector.shape_cast %38 : vector<10xf32> to vector<10x1xf32>
    %cst_24 = arith.constant 1.600000e+01 : f32
    %40 = vector.broadcast %cst_24 : f32 to vector<10x1xf32>
    %41 = arith.divf %39, %40 : vector<10x1xf32>
    %42 = vector.broadcast %41 : vector<10x1xf32> to vector<10x16xf32>
    %43 = arith.subf %35, %42 : vector<10x16xf32>
    %44 = arith.mulf %43, %43 : vector<10x16xf32>
    %cst_25 = arith.constant dense<0.000000e+00> : vector<10xf32>
    %45 = vector.multi_reduction <add>, %44, %cst_25 [1] : vector<10x16xf32> to vector<10xf32>
    %46 = vector.shape_cast %45 : vector<10xf32> to vector<10x1xf32>
    %cst_26 = arith.constant 1.600000e+01 : f32
    %47 = vector.broadcast %cst_26 : f32 to vector<10x1xf32>
    %48 = arith.divf %46, %47 : vector<10x1xf32>
    %49 = vector.broadcast %41 : vector<10x1xf32> to vector<10x16xf32>
    %50 = arith.subf %35, %49 : vector<10x16xf32>
    %cst_27 = arith.constant 9.99999974E-6 : f32
    %51 = vector.broadcast %cst_27 : f32 to vector<10x1xf32>
    %52 = arith.addf %48, %51 : vector<10x1xf32>
    %53 = math.rsqrt %52 : vector<10x1xf32>
    %54 = vector.broadcast %53 : vector<10x1xf32> to vector<10x16xf32>
    %55 = arith.mulf %50, %54 : vector<10x16xf32>
    %56 = vector.broadcast %36 : vector<1x16xf32> to vector<10x16xf32>
    %57 = arith.mulf %55, %56 : vector<10x16xf32>
    %58 = vector.broadcast %37 : vector<1x16xf32> to vector<10x16xf32>
    %59 = arith.addf %57, %58 : vector<10x16xf32>
    %60 = arith.truncf %59 : vector<10x16xf32> to vector<10x16xbf16>
    %c0_28 = arith.constant 0 : index
    %c0_29 = arith.constant 0 : index
    %61 = vector.load %arg8[%c0_28, %c0_29] : memref<16x32xbf16, #tpu.memory_space<vmem>>, vector<16x32xbf16>
    %cst_30 = arith.constant dense<0.000000e+00> : vector<10x32xf32>
    %62 = tpu.matmul %60, %61, %cst_30 {dimension_numbers = #tpu.dot_dimension_numbers<[1], [0], [0], [1], [0, 0, 1, 1], [], []>} : vector<10x16xbf16>, vector<16x32xbf16>, vector<10x32xf32> -> vector<10x32xf32>
    %c0_31 = arith.constant 0 : index
    %c0_32 = arith.constant 0 : index
    %63 = vector.load %arg9[%c0_31, %c0_32] : memref<1x32xf32, #tpu.memory_space<vmem>>, vector<1x32xf32>
    %64 = vector.broadcast %63 : vector<1x32xf32> to vector<10x32xf32>
    %65 = arith.addf %62, %64 : vector<10x32xf32>
    %66 = arith.truncf %34 : vector<10x32xf32> to vector<10x32xbf16>
    %c0_33 = arith.constant 0 : index
    %c0_34 = arith.constant 0 : index
    %67 = vector.load %arg10[%c0_33, %c0_34] : memref<64x32xbf16, #tpu.memory_space<vmem>>, vector<32x32xbf16>
    %cst_35 = arith.constant dense<0.000000e+00> : vector<10x32xf32>
    %68 = tpu.matmul %66, %67, %cst_35 {dimension_numbers = #tpu.dot_dimension_numbers<[1], [0], [0], [1], [0, 0, 1, 1], [], []>} : vector<10x32xbf16>, vector<32x32xbf16>, vector<10x32xf32> -> vector<10x32xf32>
    %69 = arith.truncf %65 : vector<10x32xf32> to vector<10x32xbf16>
    %c32 = arith.constant 32 : index
    %c0_36 = arith.constant 0 : index
    %70 = vector.load %arg10[%c32, %c0_36] : memref<64x32xbf16, #tpu.memory_space<vmem>>, vector<32x32xbf16>
    %cst_37 = arith.constant dense<0.000000e+00> : vector<10x32xf32>
    %71 = tpu.matmul %69, %70, %cst_37 {dimension_numbers = #tpu.dot_dimension_numbers<[1], [0], [0], [1], [0, 0, 1, 1], [], []>} : vector<10x32xbf16>, vector<32x32xbf16>, vector<10x32xf32> -> vector<10x32xf32>
    %72 = arith.addf %68, %71 : vector<10x32xf32>
    %c0_38 = arith.constant 0 : index
    %c0_39 = arith.constant 0 : index
    %73 = vector.load %arg11[%c0_38, %c0_39] : memref<1x32xf32, #tpu.memory_space<vmem>>, vector<1x32xf32>
    %74 = vector.broadcast %73 : vector<1x32xf32> to vector<10x32xf32>
    %75 = arith.addf %72, %74 : vector<10x32xf32>
    %c0_40 = arith.constant 0 : index
    %c0_41 = arith.constant 0 : index
    %76 = vector.load %arg13[%c0_40, %c0_41] : memref<10x1xf32, #tpu.memory_space<vmem>>, vector<10x1xf32>
    %cst_42 = arith.constant 1.000000e+00 : f32
    %77 = vector.broadcast %cst_42 : f32 to vector<10x1xf32>
    %78 = arith.subf %77, %76 : vector<10x1xf32>
    %79 = vector.broadcast %78 : vector<10x1xf32> to vector<10x32xf32>
    %80 = arith.mulf %75, %79 : vector<10x32xf32>
    %c0_43 = arith.constant 0 : index
    %c0_44 = arith.constant 0 : index
    %81 = vector.load %arg12[%c0_43, %c0_44] : memref<10x32xf32, #tpu.memory_space<vmem>>, vector<10x32xf32>
    %82 = arith.addf %80, %81 : vector<10x32xf32>
    %83 = arith.truncf %82 : vector<10x32xf32> to vector<10x32xbf16>
    %c0_45 = arith.constant 0 : index
    %c0_46 = arith.constant 0 : index
    %84 = vector.load %arg15[%c0_45, %c0_46] : memref<32x64xbf16, #tpu.memory_space<vmem>>, vector<32x64xbf16>
    %cst_47 = arith.constant dense<0.000000e+00> : vector<10x64xf32>
    %85 = tpu.matmul %83, %84, %cst_47 {dimension_numbers = #tpu.dot_dimension_numbers<[1], [0], [0], [1], [0, 0, 1, 1], [], []>} : vector<10x32xbf16>, vector<32x64xbf16>, vector<10x64xf32> -> vector<10x64xf32>
    %cst_48 = arith.constant 0.000000e+00 : f32
    %86 = vector.broadcast %cst_48 : f32 to vector<10x32xf32>
    %87 = vector.extract_strided_slice %85 {offsets = [0, 0], sizes = [10, 32], strides = [1, 1]} : vector<10x64xf32> to vector<10x32xf32>
    %c0_49 = arith.constant 0 : index
    %c0_50 = arith.constant 0 : index
    %c0_51 = arith.constant 0 : index
    %88 = vector.load %arg17[%c0_49, %c0_50, %c0_51] : memref<2x1x32xf32, #tpu.memory_space<vmem>>, vector<1x1x32xf32>
    %89 = vector.shape_cast %88 : vector<1x1x32xf32> to vector<1x32xf32>
    %90 = vector.broadcast %89 : vector<1x32xf32> to vector<10x32xf32>
    %91 = arith.mulf %87, %90 : vector<10x32xf32>
    %cst_52 = arith.constant dense<0.000000e+00> : vector<10xf32>
    %92 = vector.multi_reduction <add>, %91, %cst_52 [1] : vector<10x32xf32> to vector<10xf32>
    %93 = vector.shape_cast %92 : vector<10xf32> to vector<10x1xf32>
    %c0_53 = arith.constant 0 : index
    %c0_54 = arith.constant 0 : index
    %c0_55 = arith.constant 0 : index
    %94 = vector.load %arg16[%c0_53, %c0_54, %c0_55] : memref<2x1x32xf32, #tpu.memory_space<vmem>>, vector<1x1x32xf32>
    %95 = vector.shape_cast %94 : vector<1x1x32xf32> to vector<1x32xf32>
    %cst_56 = arith.constant dense<0.000000e+00> : vector<1x10xf32>
    %96 = tpu.matmul %95, %87, %cst_56 {dimension_numbers = #tpu.dot_dimension_numbers<[1], [1], [0], [0], [0, 0, 1, 0], [], []>} : vector<1x32xf32>, vector<10x32xf32>, vector<1x10xf32> -> vector<1x10xf32>
    %97 = vector.broadcast %93 : vector<10x1xf32> to vector<10x10xf32>
    %98 = vector.broadcast %96 : vector<1x10xf32> to vector<10x10xf32>
    %99 = arith.addf %97, %98 : vector<10x10xf32>
    %cst_57 = arith.constant 0.000000e+00 : f32
    %100 = vector.broadcast %cst_57 : f32 to vector<10x10xf32>
    %101 = arith.cmpf ogt, %99, %100 : vector<10x10xf32>
    %cst_58 = arith.constant 2.000000e-01 : f32
    %102 = vector.broadcast %cst_58 : f32 to vector<10x10xf32>
    %103 = arith.mulf %99, %102 : vector<10x10xf32>
    %104 = arith.select %101, %99, %103 : vector<10x10xi1>, vector<10x10xf32>
    %cst_59 = arith.constant -1.000000e+30 : f32
    %105 = vector.broadcast %cst_59 : f32 to vector<10x10xf32>
    %106 = arith.select %3, %104, %105 : vector<10x10xi1>, vector<10x10xf32>
    %cst_60 = arith.constant dense<0xFF800000> : vector<10xf32>
    %107 = vector.multi_reduction <maximumf>, %106, %cst_60 [1] : vector<10x10xf32> to vector<10xf32>
    %108 = vector.shape_cast %107 : vector<10xf32> to vector<10x1xf32>
    %109 = vector.broadcast %108 : vector<10x1xf32> to vector<10x10xf32>
    %110 = arith.subf %106, %109 : vector<10x10xf32>
    %111 = math.exp %110 : vector<10x10xf32>
    %cst_61 = arith.constant 0.000000e+00 : f32
    %112 = vector.broadcast %cst_61 : f32 to vector<10x10xf32>
    %113 = arith.select %3, %111, %112 : vector<10x10xi1>, vector<10x10xf32>
    %cst_62 = arith.constant dense<0.000000e+00> : vector<10xf32>
    %114 = vector.multi_reduction <add>, %113, %cst_62 [1] : vector<10x10xf32> to vector<10xf32>
    %115 = vector.shape_cast %114 : vector<10xf32> to vector<10x1xf32>
    %116 = tpu.reciprocal %115 {approx = true} : vector<10x1xf32> -> vector<10x1xf32>
    %117 = vector.broadcast %116 : vector<10x1xf32> to vector<10x10xf32>
    %118 = arith.mulf %113, %117 : vector<10x10xf32>
    %119 = arith.truncf %118 : vector<10x10xf32> to vector<10x10xbf16>
    %120 = arith.truncf %87 : vector<10x32xf32> to vector<10x32xbf16>
    %cst_63 = arith.constant dense<0.000000e+00> : vector<10x32xf32>
    %121 = tpu.matmul %119, %120, %cst_63 {dimension_numbers = #tpu.dot_dimension_numbers<[1], [0], [0], [1], [0, 0, 1, 1], [], []>} : vector<10x10xbf16>, vector<10x32xbf16>, vector<10x32xf32> -> vector<10x32xf32>
    %c0_64 = arith.constant 0 : index
    %c0_65 = arith.constant 0 : index
    %c0_66 = arith.constant 0 : index
    %122 = vector.load %arg18[%c0_64, %c0_65, %c0_66] : memref<2x1x32xf32, #tpu.memory_space<vmem>>, vector<1x1x32xf32>
    %123 = vector.shape_cast %122 : vector<1x1x32xf32> to vector<1x32xf32>
    %124 = vector.broadcast %123 : vector<1x32xf32> to vector<10x32xf32>
    %125 = arith.addf %121, %124 : vector<10x32xf32>
    %cst_67 = arith.constant 0.000000e+00 : f32
    %126 = vector.broadcast %cst_67 : f32 to vector<10x32xf32>
    %127 = arith.maximumf %125, %126 : vector<10x32xf32>
    %128 = arith.truncf %127 : vector<10x32xf32> to vector<10x32xbf16>
    %c0_68 = arith.constant 0 : index
    %c0_69 = arith.constant 0 : index
    %129 = vector.load %arg19[%c0_68, %c0_69] : memref<64x32xbf16, #tpu.memory_space<vmem>>, vector<32x32xbf16>
    %cst_70 = arith.constant dense<0.000000e+00> : vector<10x32xf32>
    %130 = tpu.matmul %128, %129, %cst_70 {dimension_numbers = #tpu.dot_dimension_numbers<[1], [0], [0], [1], [0, 0, 1, 1], [], []>} : vector<10x32xbf16>, vector<32x32xbf16>, vector<10x32xf32> -> vector<10x32xf32>
    %131 = arith.addf %86, %130 : vector<10x32xf32>
    %132 = vector.extract_strided_slice %85 {offsets = [0, 32], sizes = [10, 32], strides = [1, 1]} : vector<10x64xf32> to vector<10x32xf32>
    %c1 = arith.constant 1 : index
    %c0_71 = arith.constant 0 : index
    %c0_72 = arith.constant 0 : index
    %133 = vector.load %arg17[%c1, %c0_71, %c0_72] : memref<2x1x32xf32, #tpu.memory_space<vmem>>, vector<1x1x32xf32>
    %134 = vector.shape_cast %133 : vector<1x1x32xf32> to vector<1x32xf32>
    %135 = vector.broadcast %134 : vector<1x32xf32> to vector<10x32xf32>
    %136 = arith.mulf %132, %135 : vector<10x32xf32>
    %cst_73 = arith.constant dense<0.000000e+00> : vector<10xf32>
    %137 = vector.multi_reduction <add>, %136, %cst_73 [1] : vector<10x32xf32> to vector<10xf32>
    %138 = vector.shape_cast %137 : vector<10xf32> to vector<10x1xf32>
    %c1_74 = arith.constant 1 : index
    %c0_75 = arith.constant 0 : index
    %c0_76 = arith.constant 0 : index
    %139 = vector.load %arg16[%c1_74, %c0_75, %c0_76] : memref<2x1x32xf32, #tpu.memory_space<vmem>>, vector<1x1x32xf32>
    %140 = vector.shape_cast %139 : vector<1x1x32xf32> to vector<1x32xf32>
    %cst_77 = arith.constant dense<0.000000e+00> : vector<1x10xf32>
    %141 = tpu.matmul %140, %132, %cst_77 {dimension_numbers = #tpu.dot_dimension_numbers<[1], [1], [0], [0], [0, 0, 1, 0], [], []>} : vector<1x32xf32>, vector<10x32xf32>, vector<1x10xf32> -> vector<1x10xf32>
    %142 = vector.broadcast %138 : vector<10x1xf32> to vector<10x10xf32>
    %143 = vector.broadcast %141 : vector<1x10xf32> to vector<10x10xf32>
    %144 = arith.addf %142, %143 : vector<10x10xf32>
    %cst_78 = arith.constant 0.000000e+00 : f32
    %145 = vector.broadcast %cst_78 : f32 to vector<10x10xf32>
    %146 = arith.cmpf ogt, %144, %145 : vector<10x10xf32>
    %cst_79 = arith.constant 2.000000e-01 : f32
    %147 = vector.broadcast %cst_79 : f32 to vector<10x10xf32>
    %148 = arith.mulf %144, %147 : vector<10x10xf32>
    %149 = arith.select %146, %144, %148 : vector<10x10xi1>, vector<10x10xf32>
    %cst_80 = arith.constant -1.000000e+30 : f32
    %150 = vector.broadcast %cst_80 : f32 to vector<10x10xf32>
    %151 = arith.select %3, %149, %150 : vector<10x10xi1>, vector<10x10xf32>
    %cst_81 = arith.constant dense<0xFF800000> : vector<10xf32>
    %152 = vector.multi_reduction <maximumf>, %151, %cst_81 [1] : vector<10x10xf32> to vector<10xf32>
    %153 = vector.shape_cast %152 : vector<10xf32> to vector<10x1xf32>
    %154 = vector.broadcast %153 : vector<10x1xf32> to vector<10x10xf32>
    %155 = arith.subf %151, %154 : vector<10x10xf32>
    %156 = math.exp %155 : vector<10x10xf32>
    %cst_82 = arith.constant 0.000000e+00 : f32
    %157 = vector.broadcast %cst_82 : f32 to vector<10x10xf32>
    %158 = arith.select %3, %156, %157 : vector<10x10xi1>, vector<10x10xf32>
    %cst_83 = arith.constant dense<0.000000e+00> : vector<10xf32>
    %159 = vector.multi_reduction <add>, %158, %cst_83 [1] : vector<10x10xf32> to vector<10xf32>
    %160 = vector.shape_cast %159 : vector<10xf32> to vector<10x1xf32>
    %161 = tpu.reciprocal %160 {approx = true} : vector<10x1xf32> -> vector<10x1xf32>
    %162 = vector.broadcast %161 : vector<10x1xf32> to vector<10x10xf32>
    %163 = arith.mulf %158, %162 : vector<10x10xf32>
    %164 = arith.truncf %163 : vector<10x10xf32> to vector<10x10xbf16>
    %165 = arith.truncf %132 : vector<10x32xf32> to vector<10x32xbf16>
    %cst_84 = arith.constant dense<0.000000e+00> : vector<10x32xf32>
    %166 = tpu.matmul %164, %165, %cst_84 {dimension_numbers = #tpu.dot_dimension_numbers<[1], [0], [0], [1], [0, 0, 1, 1], [], []>} : vector<10x10xbf16>, vector<10x32xbf16>, vector<10x32xf32> -> vector<10x32xf32>
    %c1_85 = arith.constant 1 : index
    %c0_86 = arith.constant 0 : index
    %c0_87 = arith.constant 0 : index
    %167 = vector.load %arg18[%c1_85, %c0_86, %c0_87] : memref<2x1x32xf32, #tpu.memory_space<vmem>>, vector<1x1x32xf32>
    %168 = vector.shape_cast %167 : vector<1x1x32xf32> to vector<1x32xf32>
    %169 = vector.broadcast %168 : vector<1x32xf32> to vector<10x32xf32>
    %170 = arith.addf %166, %169 : vector<10x32xf32>
    %cst_88 = arith.constant 0.000000e+00 : f32
    %171 = vector.broadcast %cst_88 : f32 to vector<10x32xf32>
    %172 = arith.maximumf %170, %171 : vector<10x32xf32>
    %173 = arith.truncf %172 : vector<10x32xf32> to vector<10x32xbf16>
    %c32_89 = arith.constant 32 : index
    %c0_90 = arith.constant 0 : index
    %174 = vector.load %arg19[%c32_89, %c0_90] : memref<64x32xbf16, #tpu.memory_space<vmem>>, vector<32x32xbf16>
    %cst_91 = arith.constant dense<0.000000e+00> : vector<10x32xf32>
    %175 = tpu.matmul %173, %174, %cst_91 {dimension_numbers = #tpu.dot_dimension_numbers<[1], [0], [0], [1], [0, 0, 1, 1], [], []>} : vector<10x32xbf16>, vector<32x32xbf16>, vector<10x32xf32> -> vector<10x32xf32>
    %176 = arith.addf %131, %175 : vector<10x32xf32>
    %c0_92 = arith.constant 0 : index
    %c0_93 = arith.constant 0 : index
    %177 = vector.load %arg21[%c0_92, %c0_93] : memref<1x32xf32, #tpu.memory_space<vmem>>, vector<1x32xf32>
    %178 = vector.broadcast %177 : vector<1x32xf32> to vector<10x32xf32>
    %179 = arith.mulf %176, %178 : vector<10x32xf32>
    %cst_94 = arith.constant dense<0.000000e+00> : vector<10xf32>
    %180 = vector.multi_reduction <add>, %179, %cst_94 [1] : vector<10x32xf32> to vector<10xf32>
    %181 = vector.shape_cast %180 : vector<10xf32> to vector<10x1xf32>
    %c0_95 = arith.constant 0 : index
    %c0_96 = arith.constant 0 : index
    %182 = vector.load %arg20[%c0_95, %c0_96] : memref<1x32xf32, #tpu.memory_space<vmem>>, vector<1x32xf32>
    %183 = vector.broadcast %182 : vector<1x32xf32> to vector<10x32xf32>
    %184 = arith.mulf %176, %183 : vector<10x32xf32>
    %cst_97 = arith.constant dense<0.000000e+00> : vector<10xf32>
    %185 = vector.multi_reduction <add>, %184, %cst_97 [1] : vector<10x32xf32> to vector<10xf32>
    %186 = vector.shape_cast %185 : vector<10xf32> to vector<10x1xf32>
    %c0_98 = arith.constant 0 : index
    %c0_99 = arith.constant 0 : index
    %187 = vector.load %arg20[%c0_98, %c0_99] : memref<1x32xf32, #tpu.memory_space<vmem>>, vector<1x32xf32>
    %cst_100 = arith.constant dense<0.000000e+00> : vector<1x10xf32>
    %188 = tpu.matmul %187, %176, %cst_100 {dimension_numbers = #tpu.dot_dimension_numbers<[1], [1], [0], [0], [0, 0, 1, 0], [], []>} : vector<1x32xf32>, vector<10x32xf32>, vector<1x10xf32> -> vector<1x10xf32>
    %189 = vector.broadcast %181 : vector<10x1xf32> to vector<10x10xf32>
    %190 = vector.broadcast %188 : vector<1x10xf32> to vector<10x10xf32>
    %191 = arith.addf %189, %190 : vector<10x10xf32>
    %cst_101 = arith.constant 0.000000e+00 : f32
    %192 = vector.broadcast %cst_101 : f32 to vector<10x10xf32>
    %193 = arith.cmpf ogt, %191, %192 : vector<10x10xf32>
    %cst_102 = arith.constant 2.000000e-01 : f32
    %194 = vector.broadcast %cst_102 : f32 to vector<10x10xf32>
    %195 = arith.mulf %191, %194 : vector<10x10xf32>
    %196 = arith.select %193, %191, %195 : vector<10x10xi1>, vector<10x10xf32>
    %cst_103 = arith.constant -1.000000e+30 : f32
    %197 = vector.broadcast %cst_103 : f32 to vector<10x10xf32>
    %198 = arith.select %3, %196, %197 : vector<10x10xi1>, vector<10x10xf32>
    %cst_104 = arith.constant dense<0xFF800000> : vector<10xf32>
    %199 = vector.multi_reduction <maximumf>, %198, %cst_104 [1] : vector<10x10xf32> to vector<10xf32>
    %200 = vector.shape_cast %199 : vector<10xf32> to vector<10x1xf32>
    %201 = vector.broadcast %200 : vector<10x1xf32> to vector<10x10xf32>
    %202 = arith.subf %198, %201 : vector<10x10xf32>
    %203 = math.exp %202 : vector<10x10xf32>
    %cst_105 = arith.constant 0.000000e+00 : f32
    %204 = vector.broadcast %cst_105 : f32 to vector<10x10xf32>
    %205 = arith.select %3, %203, %204 : vector<10x10xi1>, vector<10x10xf32>
    %cst_106 = arith.constant dense<0.000000e+00> : vector<10xf32>
    %206 = vector.multi_reduction <add>, %205, %cst_106 [1] : vector<10x10xf32> to vector<10xf32>
    %207 = vector.shape_cast %206 : vector<10xf32> to vector<10x1xf32>
    %208 = tpu.reciprocal %207 {approx = true} : vector<10x1xf32> -> vector<10x1xf32>
    %209 = tpu.iota {dimensions = array<i32: 0>} : vector<2x10xi32>
    %210 = tpu.iota {dimensions = array<i32: 1>} : vector<2x10xi32>
    %c8_i32 = arith.constant 8 : i32
    %211 = vector.broadcast %c8_i32 : i32 to vector<2x10xi32>
    %212 = arith.addi %209, %211 : vector<2x10xi32>
    %213 = arith.cmpi eq, %210, %212 : vector<2x10xi32>
    %214 = arith.extui %213 : vector<2x10xi1> to vector<2x10xi32>
    %215 = arith.sitofp %214 : vector<2x10xi32> to vector<2x10xf32>
    %cst_107 = arith.constant dense<0.000000e+00> : vector<2x10xf32>
    %216 = tpu.matmul %215, %205, %cst_107 {dimension_numbers = #tpu.dot_dimension_numbers<[1], [0], [0], [1], [0, 0, 1, 1], [], []>} : vector<2x10xf32>, vector<10x10xf32>, vector<2x10xf32> -> vector<2x10xf32>
    %cst_108 = arith.constant dense<0.000000e+00> : vector<2x1xf32>
    %217 = tpu.matmul %215, %208, %cst_108 {dimension_numbers = #tpu.dot_dimension_numbers<[1], [0], [0], [1], [0, 0, 1, 1], [], []>} : vector<2x10xf32>, vector<10x1xf32>, vector<2x1xf32> -> vector<2x1xf32>
    %218 = vector.broadcast %217 : vector<2x1xf32> to vector<2x10xf32>
    %219 = arith.mulf %216, %218 : vector<2x10xf32>
    %cst_109 = arith.constant dense<0.000000e+00> : vector<2x32xf32>
    %220 = tpu.matmul %219, %176, %cst_109 {dimension_numbers = #tpu.dot_dimension_numbers<[1], [0], [0], [1], [0, 0, 1, 1], [], []>} : vector<2x10xf32>, vector<10x32xf32>, vector<2x32xf32> -> vector<2x32xf32>
    %c0_110 = arith.constant 0 : index
    %c0_111 = arith.constant 0 : index
    %221 = vector.load %arg22[%c0_110, %c0_111] : memref<1x32xf32, #tpu.memory_space<vmem>>, vector<1x32xf32>
    %222 = vector.broadcast %221 : vector<1x32xf32> to vector<2x32xf32>
    %223 = arith.addf %220, %222 : vector<2x32xf32>
    %c0_112 = arith.constant 0 : index
    %c0_113 = arith.constant 0 : index
    %224 = vector.load %arg25[%c0_112, %c0_113] : memref<2x32xf32, #tpu.memory_space<vmem>>, vector<2x32xf32>
    tpu.vector_store %arg25[%c0_112, %c0_113], %223 {strides = array<i32>} : memref<2x32xf32, #tpu.memory_space<vmem>>, vector<2x32xf32>,
    %225 = tpu.iota {dimensions = array<i32: 1>} : vector<38x10xi32>
    %c0_114 = arith.constant 0 : index
    %c0_115 = arith.constant 0 : index
    %226 = vector.load %arg23[%c0_114, %c0_115] : memref<38x1xi32, #tpu.memory_space<vmem>>, vector<38x1xi32>
    %227 = vector.broadcast %226 : vector<38x1xi32> to vector<38x10xi32>
    %228 = arith.cmpi eq, %225, %227 : vector<38x10xi32>
    %229 = arith.extui %228 : vector<38x10xi1> to vector<38x10xi32>
    %230 = arith.sitofp %229 : vector<38x10xi32> to vector<38x10xf32>
    %c0_116 = arith.constant 0 : index
    %c0_117 = arith.constant 0 : index
    %231 = vector.load %arg24[%c0_116, %c0_117] : memref<38x1xi32, #tpu.memory_space<vmem>>, vector<38x1xi32>
    %232 = vector.broadcast %231 : vector<38x1xi32> to vector<38x10xi32>
    %233 = arith.cmpi eq, %225, %232 : vector<38x10xi32>
    %234 = arith.extui %233 : vector<38x10xi1> to vector<38x10xi32>
    %235 = arith.sitofp %234 : vector<38x10xi32> to vector<38x10xf32>
    %cst_118 = arith.constant dense<0.000000e+00> : vector<38x1xf32>
    %236 = tpu.matmul %230, %181, %cst_118 {dimension_numbers = #tpu.dot_dimension_numbers<[1], [0], [0], [1], [0, 0, 1, 1], [], []>} : vector<38x10xf32>, vector<10x1xf32>, vector<38x1xf32> -> vector<38x1xf32>
    %cst_119 = arith.constant dense<0.000000e+00> : vector<38x1xf32>
    %237 = tpu.matmul %230, %200, %cst_119 {dimension_numbers = #tpu.dot_dimension_numbers<[1], [0], [0], [1], [0, 0, 1, 1], [], []>} : vector<38x10xf32>, vector<10x1xf32>, vector<38x1xf32> -> vector<38x1xf32>
    %cst_120 = arith.constant dense<0.000000e+00> : vector<38x1xf32>
    %238 = tpu.matmul %230, %208, %cst_120 {dimension_numbers = #tpu.dot_dimension_numbers<[1], [0], [0], [1], [0, 0, 1, 1], [], []>} : vector<38x10xf32>, vector<10x1xf32>, vector<38x1xf32> -> vector<38x1xf32>
    %cst_121 = arith.constant dense<0.000000e+00> : vector<38x1xf32>
    %239 = tpu.matmul %235, %186, %cst_121 {dimension_numbers = #tpu.dot_dimension_numbers<[1], [0], [0], [1], [0, 0, 1, 1], [], []>} : vector<38x10xf32>, vector<10x1xf32>, vector<38x1xf32> -> vector<38x1xf32>
    %240 = arith.addf %236, %239 : vector<38x1xf32>
    %cst_122 = arith.constant 0.000000e+00 : f32
    %241 = vector.broadcast %cst_122 : f32 to vector<38x1xf32>
    %242 = arith.cmpf ogt, %240, %241 : vector<38x1xf32>
    %cst_123 = arith.constant 2.000000e-01 : f32
    %243 = vector.broadcast %cst_123 : f32 to vector<38x1xf32>
    %244 = arith.mulf %240, %243 : vector<38x1xf32>
    %245 = arith.select %242, %240, %244 : vector<38x1xi1>, vector<38x1xf32>
    %246 = arith.subf %245, %237 : vector<38x1xf32>
    %247 = math.exp %246 : vector<38x1xf32>
    %248 = arith.mulf %247, %238 : vector<38x1xf32>
    %c0_124 = arith.constant 0 : index
    %c0_125 = arith.constant 0 : index
    %249 = vector.load %arg26[%c0_124, %c0_125] : memref<38x1xf32, #tpu.memory_space<vmem>>, vector<38x1xf32>
    tpu.vector_store %arg26[%c0_124, %c0_125], %248 {strides = array<i32>} : memref<38x1xf32, #tpu.memory_space<vmem>>, vector<38x1xf32>,
    return
  }
}

</mosaic_0001>

<bundles_post_ra>
// kernel: _fused_forward.1
= control target key start
LH: loop header
LB: loop body
LE: loop exit
PB: predicated region body
PF: predicated region fallthrough
CT: control target
= control target key end

     0   :  { %s1913_s0 = inlined_call_operand.vmem [shape: f32[10,25], index: 0, kind: input, shape index: {}]   ;;  %s1914_s1 = inlined_call_operand.vmem [shape: f32[10,16], index: 1, kind: input, shape index: {}]   ;;  %s1915_s2 = inlined_call_operand.vmem [shape: f32[1,25], index: 2, kind: input, shape index: {}]   ;;  %s1916_s3 = inlined_call_operand.vmem [shape: f32[1,25], index: 3, kind: input, shape index: {}]   ;;  %s1917_s4 = inlined_call_operand.vmem [shape: bf16[25,32], index: 4, kind: input, shape index: {}]   ;;  %s1918_s5 = inlined_call_operand.vmem [shape: f32[1,32], index: 5, kind: input, shape index: {}]   ;;  %s1919_s6 = inlined_call_operand.vmem [shape: f32[1,16], index: 6, kind: input, shape index: {}]   ;;  %s1920_s7 = inlined_call_operand.vmem [shape: f32[1,16], index: 7, kind: input, shape index: {}]   ;;  %s1921_s8 = inlined_call_operand.vmem [shape: bf16[16,32], index: 8, kind: input, shape index: {}]   ;;  %s1922_s9 = inlined_call_operand.vmem [shape: f32[1,32], index: 9, kind: input, shape index: {}]   ;;  %s1923_s10 = inlined_call_operand.vmem [shape: bf16[64,32], index: 10, kind: input, shape index: {}]   ;;  %s1924_s11 = inlined_call_operand.vmem [shape: f32[1,32], index: 11, kind: input, shape index: {}]   ;;  %s1925_s12 = inlined_call_operand.vmem [shape: f32[10,32], index: 12, kind: input, shape index: {}]   ;;  %s1926_s13 = inlined_call_operand.vmem [shape: f32[10,1], index: 13, kind: input, shape index: {}]   ;;  %s1927_s14 = inlined_call_operand.vmem [shape: s8[10,10], index: 14, kind: input, shape index: {}]   ;;  %s1928_s15 = inlined_call_operand.vmem [shape: bf16[32,64], index: 15, kind: input, shape index: {}]   ;;  %s1929_s16 = inlined_call_operand.vmem [shape: f32[2,1,32], index: 16, kind: input, shape index: {}]   ;;  %s1930_s17 = inlined_call_operand.vmem [shape: f32[2,1,32], index: 17, kind: input, shape index: {}]   ;;  %s1931_s18 = inlined_call_operand.vmem [shape: f32[2,1,32], index: 18, kind: input, shape index: {}]   ;;  %s1932_s19 = inlined_call_operand.vmem [shape: bf16[64,32], index: 19, kind: input, shape index: {}]   ;;  %s1933_s20 = inlined_call_operand.vmem [shape: f32[1,32], index: 20, kind: input, shape index: {}]   ;;  %s1934_s21 = inlined_call_operand.vmem [shape: f32[1,32], index: 21, kind: input, shape index: {}]   ;;  %s1935_s22 = inlined_call_operand.vmem [shape: f32[1,32], index: 22, kind: input, shape index: {}]   ;;  %s1936_s23 = inlined_call_operand.vmem [shape: s32[38,1], index: 23, kind: input, shape index: {}]   ;;  %s1937_s24 = inlined_call_operand.vmem [shape: s32[38,1], index: 24, kind: input, shape index: {}]   ;;  %s1938_s25 = inlined_call_operand.hbm [shape: f32[2,32], index: 25, kind: output, shape index: {0}]   ;;  %s1939_s26 = inlined_call_operand.vmem [shape: f32[38,1], index: 26, kind: output, shape index: {1}]  }
   0x1   :  { %1944 = sst [smem:[#allocation5_spill]] %s1913_s0 }
   0x2   :  { %1945 = sst [smem:[#allocation6_spill]] %s1914_s1 }
   0x3   :  { %1946 = sst [smem:[#allocation7_spill]] %s1915_s2 }
   0x4   :  { %1947 = sst [smem:[#allocation8_spill]] %s1916_s3 }
   0x5   :  { %1948 = sst [smem:[#allocation9_spill]] %s1917_s4 }
   0x6   :  { %1949 = sst [smem:[#allocation10_spill]] %s1918_s5 }
   0x7   :  { %1950 = sst [smem:[#allocation11_spill]] %s1919_s6 }
   0x8   :  { %1951 = sst [smem:[#allocation12_spill]] %s1920_s7 }
   0x9   :  { %1952 = sst [smem:[#allocation13_spill]] %s1921_s8 }
   0xa   :  { %1953 = sst [smem:[#allocation14_spill]] %s1922_s9 }
   0xb   :  { %1954 = sst [smem:[#allocation15_spill]] %s1923_s10 }
   0xc   :  { %s1955_s7 = sld [smem:[#allocation6_spill]]  ;;  %vm207_vm0 = vcmask 130048   ;;  %vm96_vm1 = vcmask 203776   ;;  %vm211_vm2 = vcmask 123904   ;;  %vm100_vm3 = vcmask 197632  }
   0xd   :  { %s1956_s4 = sld [smem:[#allocation5_spill]] }
  0x12   :  { %v203_v0 = vld [vmem:[%s1955_s7] sm:$0xff]  ;;  %v204_v4 = vld [vmem:[%s1955_s7 + $0x8] sm:$0x3] }
  0x13   :  { %v92_v1 = vld [vmem:[%s1956_s4] sm:$0xff]  ;;  %v208_v2 = vsel %vm207_vm0, %v203_v0, 0.0  ;;  %v93_v5 = vld [vmem:[%s1956_s4 + $0x8] sm:$0x3]  ;;  %v212_v6 = vsel %vm211_vm2, %v204_v4, 0.0 }
  0x14   :  { %v97_v3 = vsel %vm96_vm1, %v92_v1, 0.0  ;;  %209 = vadd.xlane.f32.xlu1 %v208_v2  ;;  %v101_v7 = vsel %vm100_vm3, %v93_v5, 0.0 }
  0x15   :  { %98 = vadd.xlane.f32.xlu0 %v97_v3 }
  0x16   :  { %32 = vsyncpa [#allocation3], 0  ;;  %v1430_v8 = vmov 16.0   ;;  %v1431_v9 = vmov 25.0   ;;  %s1957_s10 = sld [smem:[#allocation9_spill]]  ;;  %vm182_vm6 = vcmask 1043456  }
  0x17   :  { %1358 = vrcp.f32 %v1430_v8  ;;  %vm183_vm7 = vcmask 1044480   ;;  %v1432_v45 = vmov 65535   ;;  %s1958_s7 = sld [smem:[#allocation13_spill]] }
  0x18   :  { %1360 = vrcp.f32 %v1431_v9  ;;  %v184_v46 = vsel %vm182_vm6, 4294967295, %v1432_v45  ;;  %s1959_s0 = sld [smem:[#allocation11_spill]] }
  0x19   :  { %v185_v47 = vsel %vm183_vm7, %v184_v46, 0  ;;  %s1960_s2 = sld [smem:[#allocation7_spill]] }
  0x1a   :  { %s1961_s6 = sld [smem:[#allocation12_spill]] }
  0x1b   :  { %s1962_s3 = sld [smem:[#allocation8_spill]] }
  0x1c   :  { %213 = vadd.xlane.f32.xlu1 %v212_v6  ;;  %v1211_v42 = vld [vmem:[%s1957_s10 + $0x8] sm:$0xf]  ;;  %v1321_v43 = vld [vmem:[%s1957_s10 + $0x8] sm:$0x10]  ;;  %v1320_v54 = vld [vmem:[%s1957_s10] sm:$0xff]  ;;  %s1963_s8 = sld [smem:[#allocation15_spill]] }
  0x1d   :  { %102 = vadd.xlane.f32.xlu0 %v101_v7  ;;  %v1359_v10 = vpop.eup %1358  ;;  %v1212_v44 = vor.u32 %v1321_v43, %v1211_v42  ;;  %v1322_v51 = vld [vmem:[%s1958_s7] sm:$0xff]  ;;  %s1964_s7 = sld [smem:[#allocation14_spill]] }
  0x1e   :  { %v1361_v11 = vpop.eup %1360  ;;  %v216_v12 = vmul.f32 16.0, %v1359_v10  ;;  %vm220_vm4 = vweird.f32 %v1359_v10  ;;  %293 = vmatpush.bf16.msra.mxu1 %v1322_v51  ;;  %v1433_v51 = vmov 0   ;;  %s1965_s4 = sld [smem:[#allocation10_spill]] }
  0x1f   :  { %v105_v13 = vmul.f32 25.0, %v1361_v11  ;;  %vm109_vm5 = vweird.f32 %v1361_v11  ;;  %v187_v48 = vand.u32 %v1212_v44, %v185_v47  ;;  %1342 = vset.pattern.permute.xlu0 %v1433_v51  ;;  %1341 = vset.pattern.permute.xlu2 %v1433_v51 }
  0x20   :  { %v217_v14 = vsub.f32 1.0, %v216_v12  ;;  %1343 = vset.pattern.permute.xlu1 %v1433_v51 }
  0x21   :  { %v106_v15 = vsub.f32 1.0, %v105_v13  ;;  %195 = vmatpush.bf16.msra.mxu0 %v187_v48 }
  0x22   :  { %v218_v16 = vmul.f32 %v1359_v10, %v217_v14  ;;  %v1324_v46 = vld [vmem:[%s1963_s8 + $0x8] sm:$0xff]  ;;  %v1325_v47 = vld [vmem:[%s1963_s8 + $0x10] sm:$0xff]  ;;  %v1323_v48 = vld [vmem:[%s1963_s8] sm:$0xff] }
  0x23   :  { %v107_v17 = vmul.f32 %v1361_v11, %v106_v15  ;;  %361 = vmatpush.bf16.msra.mxu3 %v1324_v46 }
  0x24   :  { %v219_v18 = vadd.f32 %v1359_v10, %v218_v16 }
  0x25   :  { %v108_v19 = vadd.f32 %v1361_v11, %v107_v17  ;;  %196 = vmatpush.bf16.msra.mxu0 %v1320_v54 }
  0x26   :  { %v221_v20 = vsel %vm220_vm4, %v1359_v10, %v219_v18 }
  0x27   :  { %v110_v21 = vsel %vm109_vm5, %v1361_v11, %v108_v19  ;;  %362 = vmatpush.bf16.msra.mxu3 %v1323_v48 }
  0x87   :  { %v210_v22 = vpop.xlane.xlu1 %209 }
  0x88   :  { %v99_v23 = vpop.xlane.xlu0 %98  ;;  %v222_v24 = vmul.f32 %v221_v20, %v210_v22 }
  0x89   :  { %v111_v25 = vmul.f32 %v110_v21, %v99_v23 }
  0x8a   :  { %v1589_v26 = vsub.f32 %v203_v0, %v222_v24  ;;  %v1346_v24 = vld [vmem:[%s1959_s0] ss:$0 sm:$0xff] }
  0x8b   :  { %v1591_v27 = vsub.f32 %v92_v1, %v111_v25 }
  0x8c   :  { %v226_v28 = vmul.f32 %v1589_v26, %v1589_v26 }
  0x8d   :  { %v115_v29 = vmul.f32 %v1591_v27, %v1591_v27 }
  0x8e   :  { %v228_v30 = vsel %vm207_vm0, %v226_v28, 0.0 }
  0x8f   :  { %v117_v31 = vsel %vm96_vm1, %v115_v29, 0.0  ;;  %v214_v32 = vpop.xlane.xlu1 %213  ;;  %229 = vadd.xlane.f32.xlu0 %v228_v30  ;;  %v1344_v29 = vld [vmem:[%s1960_s2] ss:$0 sm:$0xff] }
  0x90   :  { %118 = vadd.xlane.f32.xlu2 %v117_v31  ;;  %v103_v33 = vpop.xlane.xlu0 %102  ;;  %v223_v34 = vmul.f32 %v221_v20, %v214_v32 }
  0x91   :  { %v112_v35 = vmul.f32 %v110_v21, %v103_v33 }
  0x92   :  { %v1599_v36 = vsub.f32 %v204_v4, %v223_v34  ;;  %v1347_v34 = vld [vmem:[%s1961_s6] ss:$0 sm:$0xff] }
  0x93   :  { %v1601_v37 = vsub.f32 %v93_v5, %v112_v35 }
  0x94   :  { %v227_v38 = vmul.f32 %v1599_v36, %v1599_v36 }
  0x95   :  { %v116_v39 = vmul.f32 %v1601_v37, %v1601_v37 }
  0x96   :  { %v231_v40 = vsel %vm211_vm2, %v227_v38, 0.0  ;;  %v1345_v38 = vld [vmem:[%s1962_s3] ss:$0 sm:$0xff] }
  0x97   :  { %v120_v41 = vsel %vm100_vm3, %v116_v39, 0.0  ;;  %232 = vadd.xlane.f32.xlu1 %v231_v40 }
  0x98   :  { %121 = vadd.xlane.f32.xlu2 %v120_v41 }
 0x102   :  { %v230_v50 = vpop.xlane.xlu0 %229 }
 0x103   :  { %v119_v49 = vpop.xlane.xlu2 %118  ;;  %v234_v53 = vmul.f32 %v230_v50, %v221_v20  ;;  %v375_v50 = vld [vmem:[%s1926_s13] sm:$0xff] }
 0x104   :  { %v123_v52 = vmul.f32 %v119_v49, %v110_v21  ;;  %v376_v49 = vld [vmem:[%s1926_s13 + $0x8] sm:$0x3] }
 0x105   :  { %v236_v56 = vadd.f32 1e-05, %v234_v53  ;;  %v377_v53 = vsub.f32 1.0, %v375_v50 }
 0x106   :  { %v125_v55 = vadd.f32 1e-05, %v123_v52  ;;  %v378_v52 = vsub.f32 1.0, %v376_v49 }
 0x107   :  { %vm244_vm10 = vweird.f32 %v236_v56  ;;  %381 = vperm.xlu2 %1341, %v377_v53  }
 0x108   :  { %1362 = vrsqrt.f32 %v125_v55  ;;  %vm133_vm11 = vweird.f32 %v125_v55  ;;  %386 = vperm.xlu0 %1342, %v378_v52  }
 0x109   :  { %1364 = vrsqrt.f32 %v236_v56 }
 0x10a   :  { %v233_v57 = vpop.xlane.xlu1 %232 }
 0x10b   :  { %v122_v58 = vpop.xlane.xlu2 %121  ;;  %v235_v59 = vmul.f32 %v233_v57, %v221_v20  ;;  %v1348_v57 = vld [vmem:[%s1965_s4] ss:$0 sm:$0xff] }
 0x10c   :  { %v124_v60 = vmul.f32 %v122_v58, %v110_v21 }
 0x10d   :  { %v237_v62 = vadd.f32 1e-05, %v235_v59 }
 0x10e   :  { %v1363_v61 = vpop.eup %1362  ;;  %v126_v63 = vadd.f32 1e-05, %v124_v60 }
 0x10f   :  { %v1365_v0 = vpop.eup %1364  ;;  %v128_v1 = vmul.f32 %v1363_v61, %v125_v55  ;;  %1366 = vrsqrt.f32 %v237_v62  ;;  %vm134_vm9 = vweird.f32 %v1363_v61  ;;  %vm254_vm2 = vweird.f32 %v237_v62 }
 0x110   :  { %v239_v2 = vmul.f32 %v1365_v0, %v236_v56  ;;  %1368 = vrsqrt.f32 %v126_v63  ;;  %vm245_vm8 = vweird.f32 %v1365_v0  ;;  %vm135_vm13 = vmor %vm133_vm11, %vm134_vm9  ;;  %vm143_vm4 = vweird.f32 %v126_v63  ;;  %v1349_v56 = vld [vmem:[%s1964_s7] ss:$0 sm:$0xff]  ;;  %s1437_s7 = smov [#allocation2]  }
 0x111   :  { %v129_v3 = vmul.f32 %v1363_v61, %v128_v1  ;;  %vm246_vm12 = vmor %vm244_vm10, %vm245_vm8  ;;  %vm487_vm9 = vcmask 74752  }
 0x112   :  { %v240_v4 = vmul.f32 %v1365_v0, %v239_v2  ;;  %v1328_v2 = vld [vmem:[%s1928_s15 + $0x8] sm:$0xff] }
 0x113   :  { %v130_v5 = vmul.f32 0.5, %v129_v3  ;;  %421 = vmatpush.bf16.msrb.mxu1 %v1328_v2  ;;  %v1327_v3 = vld [vmem:[%s1928_s15] sm:$0xff] }
 0x114   :  { %v241_v6 = vmul.f32 0.5, %v240_v4 }
 0x115   :  { %v131_v7 = vsub.f32 1.5, %v130_v5  ;;  %v1367_v8 = vpop.eup %1366 }
 0x116   :  { %v242_v9 = vsub.f32 1.5, %v241_v6  ;;  %v1369_v10 = vpop.eup %1368  ;;  %v249_v11 = vmul.f32 %v1367_v8, %v237_v62  ;;  %vm255_vm14 = vweird.f32 %v1367_v8 }
 0x117   :  { %v132_v12 = vmul.f32 %v1363_v61, %v131_v7  ;;  %v138_v14 = vmul.f32 %v1369_v10, %v126_v63  ;;  %vm144_vm15 = vweird.f32 %v1369_v10  ;;  %vm256_vm3 = vmor %vm254_vm2, %vm255_vm14  ;;  %422 = vmatpush.bf16.msrb.mxu1 %v1327_v3  ;;  %v1350_v7 = vld [vmem:[%s1924_s11] ss:$0 sm:$0xff]  ;;  %s1434_s11 = smov 96  }
 0x118   :  { %v243_v13 = vmul.f32 %v1365_v0, %v242_v9  ;;  %v250_v15 = vmul.f32 %v1367_v8, %v249_v11  ;;  %vm145_vm5 = vmor %vm143_vm4, %vm144_vm15 }
 0x119   :  { %v139_v16 = vmul.f32 %v1369_v10, %v138_v14  ;;  %v136_v19 = vsel %vm135_vm13, %v1363_v61, %v132_v12 }
 0x11a   :  { %v247_v17 = vsel %vm246_vm12, %v1365_v0, %v243_v13  ;;  %v251_v18 = vmul.f32 0.5, %v250_v15  ;;  %v147_v25 = vmul.f32 %v136_v19, %v1591_v27  ;;  %vm483_vm12 = vcmask 80896  }
 0x11b   :  { %v140_v20 = vmul.f32 0.5, %v139_v16  ;;  %v258_v22 = vmul.f32 %v247_v17, %v1589_v26  ;;  %v391_v16 = vld [vmem:[%s1925_s12] sm:$0xff]  ;;  %v392_v17 = vld [vmem:[%s1925_s12 + $0x8] sm:$0x3]  ;;  %s1435_s12 = smov 32  }
 0x11c   :  { %v252_v21 = vsub.f32 1.5, %v251_v18  ;;  %v152_v35 = vmul.f32 %v1344_v29, %v147_v25 }
 0x11d   :  { %v141_v23 = vsub.f32 1.5, %v140_v20  ;;  %v263_v33 = vmul.f32 %v1346_v24, %v258_v22 }
 0x11e   :  { %v253_v28 = vmul.f32 %v1367_v8, %v252_v21  ;;  %v157_v43 = vadd.f32 %v1345_v38, %v152_v35 }
 0x11f   :  { %v142_v30 = vmul.f32 %v1369_v10, %v141_v23  ;;  %v268_v41 = vadd.f32 %v1347_v34, %v263_v33  ;;  %v1351_v23 = vld [vmem:[%s1930_s17 + $0x1] ss:$0 sm:$0xff] }
 0x120   :  { %v257_v31 = vsel %vm256_vm3, %v1367_v8, %v253_v28 }
 0x121   :  { %v259_v26 = vmul.f32 %v257_v31, %v1599_v36  ;;  %v146_v32 = vsel %vm145_vm5, %v1369_v10, %v142_v30 }
 0x122   :  { %v148_v27 = vmul.f32 %v146_v32, %v1601_v37  ;;  %v1326_v37 = vld [vmem:[%s1963_s8 + $0x18] sm:$0xff] }
 0x123   :  { %v264_v39 = vmul.f32 %v1346_v24, %v259_v26  ;;  %332 = vmatpush.bf16.msra.mxu2 %v1326_v37  ;;  %v1352_v24 = vld [vmem:[%s1930_s17] ss:$0 sm:$0xff] }
 0x124   :  { %v153_v40 = vmul.f32 %v1344_v29, %v148_v27  ;;  %v442_v26 = vld [vmem:[%s1929_s16] sm:$0x1] }
 0x125   :  { %v269_v42 = vadd.f32 %v1347_v34, %v264_v39  ;;  %v85_v39 = vld [vmem:[%s1927_s14 + $0x2] sm:$0x1] }
 0x126   :  { %v158_v44 = vadd.f32 %v1345_v38, %v153_v40  ;;  %v1251_v38 = vld [vmem:[%s1929_s16 + $0x1] sm:$0x1] }
 0x127   :  { %v270_v36 = vpack.c.bf16 %v269_v42, %v268_v41  ;;  %333 = vmatpush.bf16.msra.mxu2 %v1325_v47  ;;  %v87_v41 = vunpack.c.0.s8 %v85_v39 }
 0x128   :  { %v159_v45 = vpack.c.bf16 %v158_v44, %v157_v43 }
 0x129   :  { %1218 = vmatmul.msk.bf16.vlgmr.msra.gmra.mxu1 %vm207_vm0, %v270_v36  ;;  %vm322_vm0 = vcmask 261120   ;;  %v1713_v36 = vcvt.s32.f32 %v87_v41 }
 0x12a   :  { %1213 = vmatmul.msk.bf16.vlgmr.msra.gmra.mxu0 %vm96_vm1, %v159_v45  ;;  %vm438_vm1 = vcmask 254976  }
 0x12b   :  { %vm91_vm6 = vcmp.gt.f32.partialorder %v1713_v36, 0.0 }
 0x161   :  { %v382_v10 = vpop.permute.xlu2 %381 }
 0x17a   :  { %v387_v13 = vpop.permute.xlu0 %386 }
 0x1a6   :  { %v295_v54 = vpop.f32.mrf.mxu1 }
 0x1a7   :  { %v198_v55 = vpop.f32.mrf.mxu0  ;;  %v296_v59 = vadd.f32 %v1349_v56, %v295_v54  ;;  %v84_v54 = vld [vmem:[%s1927_s14] sm:$0x3] }
 0x1a8   :  { %v199_v62 = vadd.f32 %v1348_v57, %v198_v55  ;;  %v86_v55 = vunpack.c.0.s8 %v84_v54  ;;  %v1330_v54 = vld [vmem:[%s1932_s19 + $0x8] sm:$0xff] }
 0x1a9   :  { %719 = vmatpush.bf16.msra.mxu1 %v1330_v54 }
 0x1ae   :  { %v297_v58 = vpop.f32.mrf.mxu1 }
 0x1af   :  { %v200_v60 = vpop.f32.mrf.mxu0  ;;  %v298_v61 = vadd.f32 %v1349_v56, %v297_v58  ;;  %v1724_v56 = vcvt.s32.f32 %v86_v55  ;;  %v1329_v55 = vld [vmem:[%s1932_s19] sm:$0xff] }
 0x1b0   :  { %v201_v63 = vadd.f32 %v1348_v57, %v200_v60  ;;  %720 = vmatpush.bf16.msra.mxu1 %v1329_v55  ;;  %v907_v55 = vld [vmem:[%s1936_s23 + $0x8] sm:$0xff] }
 0x1b1   :  { %v305_v0 = vpack.c.bf16 %v298_v61, %v296_v59  ;;  %vm90_vm10 = vcmp.gt.f32.partialorder %v1724_v56, 0.0  ;;  %v909_v56 = vld [vmem:[%s1936_s23 + $0x18] sm:$0xff] }
 0x1b2   :  { %v300_v1 = vpack.c.bf16 %v201_v63, %v199_v62 }
 0x1b3   :  { %1227 = vmatmul.msk.bf16.vlgmr.msra.gmra.mxu2 %vm322_vm0, %v305_v0 }
 0x1b4   :  { %1236 = vmatmul.msk.bf16.vlgmr.msra.gmra.mxu3 %vm322_vm0, %v300_v1 }
 0x236   :  { %v335_v4 = vpop.f32.mrf.mxu2 }
 0x237   :  { %v364_v5 = vpop.f32.mrf.mxu3 }
 0x238   :  { %v365_v6 = vadd.f32 %v364_v5, %v335_v4 }
 0x23a   :  { %v373_v8 = vadd.f32 %v1350_v7, %v365_v6 }
 0x23c   :  { %v389_v14 = vmul.f32 %v382_v10, %v373_v8 }
 0x23e   :  { %v337_v9 = vpop.f32.mrf.mxu2  ;;  %v393_v19 = vadd.f32 %v391_v16, %v389_v14 }
 0x23f   :  { %v366_v11 = vpop.f32.mrf.mxu3 }
 0x240   :  { %v367_v12 = vadd.f32 %v366_v11, %v337_v9 }
 0x242   :  { %v374_v15 = vadd.f32 %v1350_v7, %v367_v12 }
 0x244   :  { %v390_v18 = vmul.f32 %v387_v13, %v374_v15 }
 0x246   :  { %v394_v20 = vadd.f32 %v392_v17, %v390_v18 }
 0x248   :  { %v395_v21 = vpack.c.bf16 %v394_v20, %v393_v19 }
 0x24a   :  { %1245 = vmatmul.msk.bf16.vlgmr.msrb.gmra.mxu1 %vm322_vm0, %v395_v21 }
 0x2c7   :  { %v424_v22 = vpop.f32.mrf.mxu1 }
 0x2c8   :  { %567 = vrot.lane.b32.xlu2 %v424_v22, %s1434_s11  ;;  %v433_v40 = vmul.f32 %v1352_v24, %v424_v22 }
 0x2ca   :  { %v435_v44 = vsel %vm322_vm0, %v433_v40, 0.0 }
 0x2cf   :  { %v426_v25 = vpop.f32.mrf.mxu1 }
 0x2d0   :  { %546 = vrot.lane.b32.xlu2 %v1351_v23, %s1435_s12  ;;  %569 = vrot.lane.b32.xlu1 %v426_v25, %s1434_s11  ;;  %v1690_v28 = vpack.c.bf16 %v426_v25, %v424_v22  ;;  %v434_v29 = vmul.f32 %v1352_v24, %v426_v25  ;;  %s1190_s12 = sshll.u32 %s1437_s7, 4  ;;  %s1191_s12 = int_to_ptr.vmem [resolvable:$true] %s1190_s12 }
 0x2d1   :  { %1246 = vmatpush.xpose.msk.msrb.mxu0 %vm322_vm0, %v426_v25 }
 0x2d2   :  { %v519_v30 = vsel %vm183_vm7, %v1690_v28, 0  ;;  %v439_v31 = vsel %vm438_vm1, %v434_v29, 0.0 }
 0x2d3   :  { %528 = vmatpush.bf16.msrb.mxu2 %v519_v30  ;;  %440 = vadd.xlane.f32.xlu0 %v439_v31 }
 0x2d5   :  { %1247 = vmatpush.xpose.msk.msrb.mxu0 %vm322_vm0, %v424_v22 }
 0x2d8   :  { %1248 = vmatmul.msk.f32.vlgmr.msrb.gmra.mxu0 %vm322_vm0, %v442_v26 }
 0x322   :  { %v568_v32 = vpop.permute.xlu2 %567 }
 0x32a   :  { %v547_v33 = vpop.permute.xlu2 %546 }
 0x32b   :  { %v549_v34 = vmul.f32 %v547_v33, %v424_v22  ;;  %v550_v27 = vmul.f32 %v547_v33, %v426_v25 }
 0x32d   :  { %553 = vrot.lane.b32.xlu1 %v549_v34, %s1434_s11  ;;  %555 = vrot.lane.b32.xlu2 %v550_v27, %s1434_s11 }
 0x342   :  { %v570_v35 = vpop.permute.xlu1 %569 }
 0x343   :  { %1252 = vmatpush.xpose.msk.msrb.mxu3 %vm322_vm0, %v570_v35 }
 0x346   :  { %v441_v45 = vpop.xlane.xlu0 %440 }
 0x347   :  { %1253 = vmatpush.xpose.msk.msrb.mxu3 %vm322_vm0, %v568_v32 }
 0x34a   :  { %1254 = vmatmul.msk.f32.vlgmr.msrb.gmra.mxu3 %vm322_vm0, %v1251_v38 }
 0x355   :  { %v469_v42 = vpop.f32.mrf.mxu0 }
 0x356   :  { %v472_v43 = vperm.slane %v469_v42, 0 }
 0x357   :  { %436 = vadd.xlane.f32.xlu1 %v435_v44 }
 0x358   :  { %v474_v37 = vadd.f32 %v472_v43, %v441_v45 }
 0x35a   :  { %vm476_vm8 = vcmp.gt.f32.partialorder %v474_v37, 0.0  ;;  %v478_v46 = vmul.f32 0.2, %v474_v37 }
 0x35c   :  { %v480_v47 = vsel %vm476_vm8, %v474_v37, %v478_v46 }
 0x35d   :  { %v482_v48 = vsel %vm91_vm6, %v480_v47, -1e+30 }
 0x35e   :  { %v488_v49 = vsel %vm487_vm9, %v482_v48, -inf }
 0x35f   :  { %489 = vmax.xlane.f32.xlu0 %v488_v49 }
 0x387   :  { %v556_v50 = vpop.permute.xlu2 %555 }
 0x388   :  { %v562_v51 = vsel %vm438_vm1, %v556_v50, 0.0 }
 0x389   :  { %563 = vadd.xlane.f32.xlu1 %v562_v51 }
 0x39f   :  { %v554_v52 = vpop.permute.xlu1 %553 }
 0x3a0   :  { %v559_v53 = vsel %vm322_vm0, %v554_v52, 0.0 }
 0x3a1   :  { %560 = vadd.xlane.f32.xlu2 %v559_v53 }
 0x3ca   :  { %v437_v57 = vpop.xlane.xlu1 %436 }
 0x3cb   :  { %v473_v58 = vadd.f32 %v472_v43, %v437_v57 }
 0x3cd   :  { %v477_v59 = vmul.f32 0.2, %v473_v58  ;;  %vm475_vm11 = vcmp.gt.f32.partialorder %v473_v58, 0.0  ;;  %v595_v63 = vpop.f32.mrf.mxu3 }
 0x3ce   :  { %v598_v0 = vperm.slane %v595_v63, 0 }
 0x3cf   :  { %v479_v60 = vsel %vm475_vm11, %v473_v58, %v477_v59  ;;  %v1353_v58 = vld [vmem:[%s1931_s18] ss:$0 sm:$0xff] }
 0x3d0   :  { %v481_v61 = vsel %vm90_vm10, %v479_v60, -1e+30 }
 0x3d1   :  { %v484_v62 = vsel %vm483_vm12, %v481_v61, -inf }
 0x3d2   :  { %485 = vmax.xlane.f32.xlu2 %v484_v62  ;;  %v490_v7 = vpop.xlane.xlu0 %489 }
 0x3d3   :  { %v492_v8 = vsub.f32 %v482_v48, %v490_v7 }
 0x3d5   :  { %v495_v9 = vmul.f32 1.442695, %v492_v8 }
 0x3d7   :  { %1370 = vpow2.f32 %v495_v9 }
 0x3dd   :  { %v1371_v16 = vpop.eup %1370 }
 0x3de   :  { %v498_v17 = vsel %vm91_vm6, %v1371_v16, 0.0 }
 0x3df   :  { %v502_v18 = vsel %vm487_vm9, %v498_v17, 0.0 }
 0x3fc   :  { %v564_v1 = vpop.xlane.xlu1 %563 }
 0x3fd   :  { %v600_v2 = vadd.f32 %v598_v0, %v564_v1  ;;  %v1332_v1 = vld [vmem:[%s1932_s19 + $0x18] sm:$0xff] }
 0x3fe   :  { %690 = vmatpush.bf16.msra.mxu3 %v1332_v1 }
 0x3ff   :  { %v604_v3 = vmul.f32 0.2, %v600_v2  ;;  %vm602_vm13 = vcmp.gt.f32.partialorder %v600_v2, 0.0 }
 0x401   :  { %v606_v4 = vsel %vm602_vm13, %v600_v2, %v604_v3  ;;  %v1331_v2 = vld [vmem:[%s1932_s19 + $0x10] sm:$0xff] }
 0x402   :  { %v608_v5 = vsel %vm91_vm6, %v606_v4, -1e+30  ;;  %691 = vmatpush.bf16.msra.mxu3 %v1331_v2  ;;  %v1354_v4 = vld [vmem:[%s1931_s18 + $0x1] ss:$0 sm:$0xff] }
 0x403   :  { %v612_v6 = vsel %vm487_vm9, %v608_v5, -inf }
 0x404   :  { %613 = vmax.xlane.f32.xlu2 %v612_v6 }
 0x414   :  { %v561_v10 = vpop.xlane.xlu2 %560 }
 0x415   :  { %v599_v11 = vadd.f32 %v598_v0, %v561_v10 }
 0x417   :  { %v603_v12 = vmul.f32 0.2, %v599_v11  ;;  %vm601_vm14 = vcmp.gt.f32.partialorder %v599_v11, 0.0 }
 0x419   :  { %v605_v13 = vsel %vm601_vm14, %v599_v11, %v603_v12  ;;  %v1355_v12 = vld [vmem:[%s1934_s21] ss:$0 sm:$0xff]  ;;  %s1192_s21 = sshll.u32 %s1938_s25, 4  ;;  %s1193_s21 = int_to_ptr.hbm [resolvable:$true] %s1192_s21 }
 0x41a   :  { %v607_v14 = vsel %vm90_vm10, %v605_v13, -1e+30 }
 0x41b   :  { %v609_v15 = vsel %vm483_vm12, %v607_v14, -inf }
 0x41c   :  { %610 = vmax.xlane.f32.xlu1 %v609_v15 }
 0x424   :  { %503 = vadd.xlane.f32.xlu1 %v502_v18 }
 0x43d   :  { %640 = vrot.lane.b32.xlu1 %v1690_v28, %s1434_s11 }
 0x445   :  { %v486_v19 = vpop.xlane.xlu2 %485 }
 0x446   :  { %v491_v20 = vsub.f32 %v481_v61, %v486_v19 }
 0x448   :  { %v493_v21 = vmul.f32 1.442695, %v491_v20 }
 0x44a   :  { %1372 = vpow2.f32 %v493_v21 }
 0x450   :  { %v1373_v22 = vpop.eup %1372 }
 0x451   :  { %v497_v23 = vsel %vm90_vm10, %v1373_v22, 0.0  ;;  %v739_v22 = vld [vmem:[%s1933_s20] sm:$0x1] }
 0x452   :  { %v499_v24 = vsel %vm483_vm12, %v497_v23, 0.0 }
 0x453   :  { %500 = vadd.xlane.f32.xlu0 %v499_v24 }
 0x477   :  { %v614_v25 = vpop.xlane.xlu2 %613 }
 0x478   :  { %v616_v29 = vsub.f32 %v608_v5, %v614_v25 }
 0x47a   :  { %v619_v30 = vmul.f32 1.442695, %v616_v29 }
 0x47c   :  { %1374 = vpow2.f32 %v619_v30 }
 0x482   :  { %v1375_v31 = vpop.eup %1374 }
 0x483   :  { %v622_v26 = vsel %vm91_vm6, %v1375_v31, 0.0 }
 0x484   :  { %v626_v28 = vsel %vm487_vm9, %v622_v26, 0.0 }
 0x485   :  { %627 = vadd.xlane.f32.xlu0 %v626_v28 }
 0x48f   :  { %v611_v32 = vpop.xlane.xlu1 %610 }
 0x490   :  { %v615_v33 = vsub.f32 %v607_v14, %v611_v32 }
 0x492   :  { %v617_v34 = vmul.f32 1.442695, %v615_v33 }
 0x494   :  { %1376 = vpow2.f32 %v617_v34 }
 0x497   :  { %v504_v39 = vpop.xlane.xlu1 %503 }
 0x498   :  { %1378 = vrcp.f32 %v504_v39  ;;  %v906_v39 = vld [vmem:[%s1936_s23] sm:$0xff] }
 0x499   :  { %912 = vperm.xlu1 %1343, %v906_v39  }
 0x49a   :  { %v1377_v27 = vpop.eup %1376 }
 0x49b   :  { %v621_v35 = vsel %vm90_vm10, %v1377_v27, 0.0 }
 0x49c   :  { %v623_v38 = vsel %vm483_vm12, %v621_v35, 0.0 }
 0x49d   :  { %624 = vadd.xlane.f32.xlu2 %v623_v38 }
 0x49e   :  { %v1379_v43 = vpop.eup %1378 }
 0x49f   :  { %v508_v45 = vmul.f32 %v1379_v43, %v498_v17 }
 0x4af   :  { %v641_v40 = vpop.permute.xlu1 %640 }
 0x4b0   :  { %v646_v41 = vsel %vm183_vm7, %v641_v40, 0  ;;  %vm823_vm7 = vcmask 1041408  }
 0x4b1   :  { %655 = vmatpush.bf16.msra.mxu0 %v646_v41 }
 0x4c6   :  { %v501_v42 = vpop.xlane.xlu0 %500 }
 0x4c7   :  { %1380 = vrcp.f32 %v501_v42 }
 0x4cd   :  { %v1381_v44 = vpop.eup %1380 }
 0x4ce   :  { %v507_v37 = vmul.f32 %v1381_v44, %v497_v23 }
 0x4d0   :  { %v509_v46 = vpack.c.bf16 %v508_v45, %v507_v37 }
 0x4d2   :  { %1249 = vmatmul.msk.bf16.vlgmr.msrb.gmra.mxu2 %vm483_vm12, %v509_v46 }
 0x4f8   :  { %v628_v47 = vpop.xlane.xlu0 %627 }
 0x4f9   :  { %1382 = vrcp.f32 %v628_v47 }
 0x4ff   :  { %v1383_v49 = vpop.eup %1382 }
 0x500   :  { %v632_v51 = vmul.f32 %v1383_v49, %v622_v26 }
 0x50b   :  { %v913_v2 = vpop.permute.xlu1 %912 }
 0x510   :  { %v625_v48 = vpop.xlane.xlu2 %624 }
 0x511   :  { %1384 = vrcp.f32 %v625_v48 }
 0x517   :  { %v1385_v50 = vpop.eup %1384 }
 0x518   :  { %v631_v52 = vmul.f32 %v1385_v50, %v621_v35  ;;  %v1356_v50 = vld [vmem:[%s1933_s20] ss:$0 sm:$0xff] }
 0x51a   :  { %v633_v53 = vpack.c.bf16 %v632_v51, %v631_v52 }
 0x51c   :  { %1256 = vmatmul.msk.bf16.vlgmr.msra.gmra.mxu0 %vm483_vm12, %v633_v53 }
 0x555   :  { %v530_v57 = vpop.f32.mrf.mxu2 }
 0x556   :  { %v531_v59 = vadd.f32 %v1353_v58, %v530_v57  ;;  %v941_v57 = vld [vmem:[%s1937_s24] sm:$0xff] }
 0x558   :  { %v535_v62 = vmax.f32 %v531_v59, 0.0  ;;  %v945_v59 = vld [vmem:[%s1937_s24 + $0x20] sm:$0x3f] }
 0x55d   :  { %v532_v60 = vpop.f32.mrf.mxu2 }
 0x55e   :  { %v533_v61 = vadd.f32 %v1353_v58, %v532_v60  ;;  %v944_v58 = vld [vmem:[%s1937_s24 + $0x18] sm:$0xff]  ;;  %v812_v60 = vlaneseq }
 0x560   :  { %v536_v63 = vmax.f32 %v533_v61, 0.0  ;;  %v813_v61 = vshrl.u32 %v812_v60, 7 }
 0x562   :  { %v537_v0 = vpack.c.bf16 %v536_v63, %v535_v62  ;;  %v1825_v62 = vand.u32 127, %v812_v60  ;;  %v816_v63 = vadd.s32 8, %v813_v61 }
 0x564   :  { %1274 = vmatmul.msk.bf16.vlgmr.msra.gmra.mxu1 %vm322_vm0, %v537_v0  ;;  %vm817_vm3 = vcmp.eq.s32.totalorder %v1825_v62, %v816_v63  ;;  %v1436_v0 = vmov 0.0   ;;  %vm926_vm4 = vcmp.eq.s32.totalorder %v1825_v62, %v913_v2 }
 0x565   :  { %v1278_v1 = vsel %vm817_vm3, 1.0, %v1436_v0 }
 0x599   :  { %v657_v3 = vpop.f32.mrf.mxu0 }
 0x59a   :  { %v658_v5 = vadd.f32 %v1354_v4, %v657_v3  ;;  %v1286_v3 = vsel %vm926_vm4, 1.0, %v1436_v0  ;;  %vm1183_vm4 = vcmask 5120  }
 0x59c   :  { %v662_v8 = vmax.f32 %v658_v5, 0.0 }
 0x5a1   :  { %v659_v6 = vpop.f32.mrf.mxu0 }
 0x5a2   :  { %v660_v7 = vadd.f32 %v1354_v4, %v659_v6 }
 0x5a4   :  { %v663_v9 = vmax.f32 %v660_v7, 0.0 }
 0x5a6   :  { %v664_v10 = vpack.c.bf16 %v663_v9, %v662_v8 }
 0x5a8   :  { %1265 = vmatmul.msk.bf16.vlgmr.msra.gmra.mxu3 %vm322_vm0, %v664_v10 }
 0x5e1   :  { %v722_v11 = vpop.f32.mrf.mxu1 }
 0x5e9   :  { %v724_v17 = vpop.f32.mrf.mxu1 }
 0x62b   :  { %v693_v13 = vpop.f32.mrf.mxu3 }
 0x62c   :  { %v723_v14 = vadd.f32 %v722_v11, %v693_v13 }
 0x62e   :  { %v731_v15 = vmul.f32 %v1355_v12, %v723_v14  ;;  %v743_v52 = vmul.f32 %v1356_v50, %v723_v14 }
 0x630   :  { %v733_v16 = vsel %vm322_vm0, %v731_v15, 0.0  ;;  %v745_v36 = vsel %vm322_vm0, %v743_v52, 0.0  ;;  %v942_v15 = vld [vmem:[%s1937_s24 + $0x8] sm:$0xff] }
 0x631   :  { %734 = vadd.xlane.f32.xlu0 %v733_v16  ;;  %v908_v16 = vld [vmem:[%s1936_s23 + $0x10] sm:$0xff] }
 0x633   :  { %v695_v18 = vpop.f32.mrf.mxu3 }
 0x634   :  { %v725_v19 = vadd.f32 %v724_v17, %v695_v18  ;;  %v943_v17 = vld [vmem:[%s1937_s24 + $0x10] sm:$0xff]  ;;  %v910_v18 = vld [vmem:[%s1936_s23 + $0x20] sm:$0x3f] }
 0x636   :  { %1275 = vmatpush.xpose.msk.msra.mxu2 %vm322_vm0, %v725_v19  ;;  %1284 = vmatpush.msk.msrb.mxu3 %vm823_vm7, %v725_v19  ;;  %v732_v20 = vmul.f32 %v1355_v12, %v725_v19  ;;  %v744_v53 = vmul.f32 %v1356_v50, %v725_v19 }
 0x638   :  { %900 = vmatpush.msrb.mxu3 %v723_v14  ;;  %v736_v21 = vsel %vm438_vm1, %v732_v20, 0.0  ;;  %v748_v54 = vsel %vm438_vm1, %v744_v53, 0.0 }
 0x639   :  { %737 = vadd.xlane.f32.xlu2 %v736_v21 }
 0x63a   :  { %1276 = vmatpush.xpose.msk.msra.mxu2 %vm322_vm0, %v723_v14 }
 0x63d   :  { %1277 = vmatmul.msk.f32.vlgmr.msra.gmra.mxu2 %vm322_vm0, %v739_v22 }
 0x6a4   :  { %v735_v24 = vpop.xlane.xlu0 %734 }
 0x6ac   :  { %v738_v23 = vpop.xlane.xlu2 %737 }
 0x6ad   :  { %1314 = vmatpush.msk.msra.mxu3 %vm823_vm7, %v738_v23 }
 0x6af   :  { %1126 = vmatpush.msra.mxu3 %v735_v24 }
 0x6c0   :  { %v776_v25 = vpop.f32.mrf.mxu2 }
 0x6c1   :  { %v779_v29 = vperm.slane %v776_v25, 0 }
 0x6c3   :  { %v780_v30 = vadd.f32 %v779_v29, %v735_v24  ;;  %v781_v31 = vadd.f32 %v779_v29, %v738_v23 }
 0x6c5   :  { %vm782_vm15 = vcmp.gt.f32.partialorder %v780_v30, 0.0  ;;  %v784_v26 = vmul.f32 0.2, %v780_v30  ;;  %vm783_vm2 = vcmp.gt.f32.partialorder %v781_v31, 0.0  ;;  %v785_v28 = vmul.f32 0.2, %v781_v31 }
 0x6c7   :  { %v786_v32 = vsel %vm782_vm15, %v780_v30, %v784_v26  ;;  %v787_v33 = vsel %vm783_vm2, %v781_v31, %v785_v28 }
 0x6c8   :  { %v788_v34 = vsel %vm90_vm10, %v786_v32, -1e+30  ;;  %v789_v27 = vsel %vm91_vm6, %v787_v33, -1e+30 }
 0x6c9   :  { %v790_v35 = vsel %vm483_vm12, %v788_v34, -inf  ;;  %v793_v38 = vsel %vm487_vm9, %v789_v27, -inf }
 0x6ca   :  { %791 = vmax.xlane.f32.xlu0 %v790_v35  ;;  %794 = vmax.xlane.f32.xlu2 %v793_v38  ;;  %v1357_v38 = vld [vmem:[%s1935_s22] ss:$0 sm:$0xff] }
 0x73d   :  { %v792_v40 = vpop.xlane.xlu0 %791  ;;  %v795_v41 = vpop.xlane.xlu2 %794 }
 0x73e   :  { %v796_v42 = vsub.f32 %v788_v34, %v792_v40  ;;  %v797_v43 = vsub.f32 %v789_v27, %v795_v41  ;;  %1296 = vmatpush.msk.msrb.mxu1 %vm823_vm7, %v795_v41 }
 0x740   :  { %v798_v44 = vmul.f32 1.442695, %v796_v42  ;;  %v800_v45 = vmul.f32 1.442695, %v797_v43  ;;  %1009 = vmatpush.msrb.mxu1 %v792_v40 }
 0x741   :  { %1297 = vmatmul.msk.f32.vlgmr.msrb.gmra.mxu1 %vm483_vm12, %v1286_v3 }
 0x742   :  { %1386 = vpow2.f32 %v798_v44 }
 0x743   :  { %1388 = vpow2.f32 %v800_v45 }
 0x748   :  { %v1387_v37 = vpop.eup %1386 }
 0x749   :  { %v1389_v46 = vpop.eup %1388  ;;  %v802_v47 = vsel %vm90_vm10, %v1387_v37, 0.0 }
 0x74a   :  { %v803_v48 = vsel %vm91_vm6, %v1389_v46, 0.0  ;;  %v804_v49 = vsel %vm483_vm12, %v802_v47, 0.0 }
 0x74b   :  { %1279 = vmatpush.msk.msrb.mxu0 %vm823_vm7, %v803_v48  ;;  %805 = vadd.xlane.f32.xlu0 %v804_v49  ;;  %v807_v51 = vsel %vm487_vm9, %v803_v48, 0.0 }
 0x74c   :  { %808 = vadd.xlane.f32.xlu2 %v807_v51 }
 0x74d   :  { %1280 = vmatpush.msk.msrb.mxu0 %vm90_vm10, %v1387_v37 }
 0x74e   :  { %1281 = vmatmul.msk.f32.vlgmr.msrb.gmra.mxu0 %vm483_vm12, %v1278_v1 }
 0x753   :  { %746 = vadd.xlane.f32.xlu0 %v745_v36 }
 0x754   :  { %749 = vadd.xlane.f32.xlu2 %v748_v54 }
 0x767   :  { %915 = vperm.xlu0 %1342, %v907_v55  }
 0x76c   :  { %947 = vperm.xlu2 %1341, %v941_v57  }
 0x76f   :  { %921 = vperm.xlu0 %1342, %v909_v56  }
 0x774   :  { %956 = vperm.xlu2 %1341, %v944_v58  }
 0x777   :  { %959 = vperm.xlu0 %1342, %v945_v59  }
 0x7be   :  { %v806_v4 = vpop.xlane.xlu0 %805  ;;  %v1011_v41 = vpop.f32.mrf.mxu1 }
 0x7bf   :  { %v809_v5 = vpop.xlane.xlu2 %808 }
 0x7c0   :  { %1390 = vrcp.f32 %v809_v5 }
 0x7c1   :  { %1392 = vrcp.f32 %v806_v4 }
 0x7c6   :  { %v1391_v6 = vpop.eup %1390  ;;  %v747_v9 = vpop.xlane.xlu0 %746 }
 0x7c7   :  { %1282 = vmatpush.msk.msrb.mxu2 %vm823_vm7, %v1391_v6  ;;  %1302 = vmatpush.msk.msra.mxu0 %vm823_vm7, %v1391_v6  ;;  %v750_v7 = vpop.xlane.xlu2 %749  ;;  %v1393_v8 = vpop.eup %1392 }
 0x7c9   :  { %865 = vmatpush.msrb.mxu2 %v1393_v8  ;;  %1041 = vmatpush.msra.mxu0 %v1393_v8 }
 0x7ca   :  { %1283 = vmatmul.msk.f32.vlgmr.msrb.gmra.mxu2 %vm483_vm12, %v1278_v1  ;;  %1303 = vmatmul.msk.f32.vlgmr.msra.gmra.mxu0 %vm483_vm12, %v1286_v3 }
 0x7cb   :  { %1308 = vmatpush.msk.msra.mxu2 %vm823_vm7, %v750_v7  ;;  %v844_v19 = vpop.f32.mrf.mxu0 }
 0x7cd   :  { %1091 = vmatpush.msra.mxu2 %v747_v9 }
 0x7cf   :  { %v948_v10 = vpop.permute.xlu2 %947 }
 0x7d0   :  { %vm961_vm5 = vcmp.eq.s32.totalorder %v1825_v62, %v948_v10 }
 0x7d1   :  { %v1291_v11 = vsel %vm961_vm5, 1.0, %v1436_v0 }
 0x7d2   :  { %1309 = vmatmul.msk.f32.vlgmr.msra.gmra.mxu2 %vm483_vm12, %v1291_v11 }
 0x7d7   :  { %v957_v28 = vpop.permute.xlu2 %956 }
 0x7d8   :  { %vm964_vm11 = vcmp.eq.s32.totalorder %v1825_v62, %v957_v28 }
 0x7d9   :  { %v916_v12 = vpop.permute.xlu0 %915  ;;  %v1294_v34 = vsel %vm964_vm11, 1.0, %v1436_v0 }
 0x7da   :  { %vm927_vm0 = vcmp.eq.s32.totalorder %v1825_v62, %v916_v12 }
 0x7db   :  { %v1287_v13 = vsel %vm927_vm0, 1.0, %v1436_v0 }
 0x7dc   :  { %1298 = vmatmul.msk.f32.gmra.mxu1 %vm483_vm12, %v1287_v13  ;;  %1304 = vmatmul.msk.f32.gmra.mxu0 %vm483_vm12, %v1287_v13 }
 0x7e1   :  { %v922_v29 = vpop.permute.xlu0 %921 }
 0x7e2   :  { %vm929_vm9 = vcmp.eq.s32.totalorder %v1825_v62, %v922_v29 }
 0x7e3   :  { %v1289_v31 = vsel %vm929_vm9, 1.0, %v1436_v0 }
 0x7e9   :  { %v960_v27 = vpop.permute.xlu0 %959 }
 0x7ea   :  { %vm965_vm14 = vcmp.eq.s32.totalorder %v1825_v62, %v960_v27 }
 0x7eb   :  { %v1295_v35 = vsel %vm965_vm14, 1.0, %v1436_v0 }
 0x847   :  { %v1043_v52 = vpop.f32.mrf.mxu0 }
 0x84d   :  { %v867_v14 = vpop.f32.mrf.mxu2 }
 0x84e   :  { %872 = vperm.xlu1 %1343, %v867_v14  }
 0x855   :  { %v1093_v42 = vpop.f32.mrf.mxu2 }
 0x856   :  { %950 = vperm.xlu1 %1343, %v942_v15  }
 0x859   :  { %v1014_v50 = vpop.f32.mrf.mxu1  ;;  %v1046_v63 = vpop.f32.mrf.mxu0 }
 0x85e   :  { %918 = vperm.xlu1 %1343, %v908_v16  }
 0x866   :  { %953 = vperm.xlu1 %1343, %v943_v17  }
 0x86e   :  { %924 = vperm.xlu1 %1343, %v910_v18  }
 0x8c0   :  { %v873_v20 = vpop.permute.xlu1 %872 }
 0x8c1   :  { %v875_v21 = vmul.f32 %v873_v20, %v844_v19 }
 0x8c3   :  { %1285 = vmatmul.msk.f32.vlgmr.msrb.gmra.mxu3 %vm483_vm12, %v875_v21 }
 0x8c8   :  { %v951_v22 = vpop.permute.xlu1 %950 }
 0x8c9   :  { %vm962_vm6 = vcmp.eq.s32.totalorder %v1825_v62, %v951_v22 }
 0x8ca   :  { %v1292_v23 = vsel %vm962_vm6, 1.0, %v1436_v0 }
 0x8cb   :  { %1310 = vmatmul.msk.f32.gmra.mxu2 %vm483_vm12, %v1292_v23  ;;  %1315 = vmatmul.msk.f32.vlgmr.msra.gmra.mxu3 %vm483_vm12, %v1286_v3 }
 0x8d0   :  { %v919_v24 = vpop.permute.xlu1 %918 }
 0x8d1   :  { %vm928_vm8 = vcmp.eq.s32.totalorder %v1825_v62, %v919_v24 }
 0x8d2   :  { %v1288_v25 = vsel %vm928_vm8, 1.0, %v1436_v0 }
 0x8d3   :  { %1299 = vmatmul.msk.f32.gmra.mxu1 %vm483_vm12, %v1288_v25  ;;  %1305 = vmatmul.msk.f32.gmra.mxu0 %vm483_vm12, %v1288_v25 }
 0x8d4   :  { %1316 = vmatmul.msk.f32.gmra.mxu3 %vm483_vm12, %v1287_v13 }
 0x8d8   :  { %v954_v30 = vpop.permute.xlu1 %953 }
 0x8d9   :  { %vm963_vm10 = vcmp.eq.s32.totalorder %v1825_v62, %v954_v30 }
 0x8da   :  { %v1293_v26 = vsel %vm963_vm10, 1.0, %v1436_v0 }
 0x8db   :  { %1300 = vmatmul.msk.f32.gmra.mxu1 %vm483_vm12, %v1289_v31  ;;  %1306 = vmatmul.msk.f32.gmra.mxu0 %vm483_vm12, %v1289_v31 }
 0x8dc   :  { %1311 = vmatmul.msk.f32.gmra.mxu2 %vm483_vm12, %v1293_v26  ;;  %1317 = vmatmul.msk.f32.gmra.mxu3 %vm483_vm12, %v1288_v25 }
 0x8e0   :  { %v925_v32 = vpop.permute.xlu1 %924 }
 0x8e1   :  { %vm930_vm13 = vcmp.eq.s32.totalorder %v1825_v62, %v925_v32 }
 0x8e2   :  { %v1290_v33 = vsel %vm930_vm13, 1.0, %v1436_v0 }
 0x8e3   :  { %1301 = vmatmul.msk.f32.gmra.mxu1 %vm483_vm12, %v1290_v33  ;;  %1307 = vmatmul.msk.f32.gmra.mxu0 %vm483_vm12, %v1290_v33 }
 0x8e4   :  { %1312 = vmatmul.msk.f32.gmra.mxu2 %vm483_vm12, %v1294_v34  ;;  %1318 = vmatmul.msk.f32.gmra.mxu3 %vm483_vm12, %v1289_v31 }
 0x8ec   :  { %1313 = vmatmul.msk.f32.gmra.mxu2 %vm483_vm12, %v1295_v35  ;;  %1319 = vmatmul.msk.f32.gmra.mxu3 %vm483_vm12, %v1290_v33 }
 0x946   :  { %v902_v39 = vpop.f32.mrf.mxu3 }
 0x947   :  { %v903_v40 = vadd.f32 %v1357_v38, %v902_v39 }
 0x949   :  { %905 = vst.msk [vmem:[#allocation2] sm:$0x3] %vm438_vm1, %v903_v40  ;;  %vm1178_vm1 = vcmask 7168  }
 0x94a   :  { %1195 = dma.vmem_to_hbm [thread:$0]  %s1191_s12, 32, %s1193_s21, [#allocation3]  }
 0x94e   :  { %v1128_v43 = vpop.f32.mrf.mxu3  ;;  %v1096_v48 = vpop.f32.mrf.mxu2 }
 0x94f   :  { %v1129_v44 = vadd.f32 %v1128_v43, %v1093_v42 }
 0x950   :  { %v1017_v60 = vpop.f32.mrf.mxu1  ;;  %v1049_v10 = vpop.f32.mrf.mxu0 }
 0x951   :  { %vm1143_vm12 = vcmp.gt.f32.partialorder %v1129_v44, 0.0  ;;  %v1148_v45 = vmul.f32 0.2, %v1129_v44 }
 0x953   :  { %v1153_v37 = vsel %vm1143_vm12, %v1129_v44, %v1148_v45 }
 0x954   :  { %v1158_v46 = vsub.f32 %v1153_v37, %v1011_v41 }
 0x956   :  { %v1163_v47 = vmul.f32 1.442695, %v1158_v46 }
 0x957   :  { %v1131_v49 = vpop.f32.mrf.mxu3 }
 0x958   :  { %1394 = vpow2.f32 %v1163_v47  ;;  %v1132_v51 = vadd.f32 %v1131_v49, %v1096_v48  ;;  %v1020_v8 = vpop.f32.mrf.mxu1  ;;  %v1052_v22 = vpop.f32.mrf.mxu0 }
 0x95a   :  { %vm1144_vm7 = vcmp.gt.f32.partialorder %v1132_v51, 0.0  ;;  %v1149_v53 = vmul.f32 0.2, %v1132_v51 }
 0x95c   :  { %v1154_v36 = vsel %vm1144_vm7, %v1132_v51, %v1149_v53 }
 0x95d   :  { %v1159_v54 = vsub.f32 %v1154_v36, %v1014_v50 }
 0x95e   :  { %v1395_v55 = vpop.eup %1394 }
 0x95f   :  { %v1173_v57 = vmul.f32 %v1395_v55, %v1043_v52  ;;  %v1165_v56 = vmul.f32 1.442695, %v1159_v54  ;;  %v1099_v58 = vpop.f32.mrf.mxu2  ;;  %v1134_v59 = vpop.f32.mrf.mxu3 }
 0x960   :  { %v1135_v61 = vadd.f32 %v1134_v59, %v1099_v58  ;;  %v1023_v20 = vpop.f32.mrf.mxu1  ;;  %v1055_v31 = vpop.f32.mrf.mxu0 }
 0x961   :  { %1179 = vst.msk [vmem:[%s1939_s26] sm:$0xff] %vm1178_vm1, %v1173_v57  ;;  %1396 = vpow2.f32 %v1165_v56 }
 0x962   :  { %vm1145_vm15 = vcmp.gt.f32.partialorder %v1135_v61, 0.0  ;;  %v1150_v62 = vmul.f32 0.2, %v1135_v61 }
 0x964   :  { %v1155_v0 = vsel %vm1145_vm15, %v1135_v61, %v1150_v62 }
 0x965   :  { %v1160_v1 = vsub.f32 %v1155_v0, %v1017_v60 }
 0x967   :  { %v1397_v2 = vpop.eup %1396  ;;  %v1167_v3 = vmul.f32 1.442695, %v1160_v1  ;;  %v1102_v4 = vpop.f32.mrf.mxu2 }
 0x968   :  { %v1137_v5 = vpop.f32.mrf.mxu3  ;;  %v1174_v6 = vmul.f32 %v1397_v2, %v1046_v63 }
 0x969   :  { %v1138_v7 = vadd.f32 %v1137_v5, %v1102_v4  ;;  %1398 = vpow2.f32 %v1167_v3 }
 0x96a   :  { %1180 = vst.msk [vmem:[%s1939_s26 + $0x8] sm:$0xff] %vm1178_vm1, %v1174_v6 }
 0x96b   :  { %vm1146_vm2 = vcmp.gt.f32.partialorder %v1138_v7, 0.0  ;;  %v1151_v9 = vmul.f32 0.2, %v1138_v7 }
 0x96d   :  { %v1156_v11 = vsel %vm1146_vm2, %v1138_v7, %v1151_v9 }
 0x96e   :  { %v1161_v12 = vsub.f32 %v1156_v11, %v1020_v8 }
 0x96f   :  { %v1399_v13 = vpop.eup %1398  ;;  %v1105_v15 = vpop.f32.mrf.mxu2 }
 0x970   :  { %v1169_v14 = vmul.f32 1.442695, %v1161_v12  ;;  %v1140_v16 = vpop.f32.mrf.mxu3  ;;  %v1175_v17 = vmul.f32 %v1399_v13, %v1049_v10 }
 0x971   :  { %v1141_v18 = vadd.f32 %v1140_v16, %v1105_v15 }
 0x972   :  { %1400 = vpow2.f32 %v1169_v14  ;;  %1181 = vst.msk [vmem:[%s1939_s26 + $0x10] sm:$0xff] %vm1178_vm1, %v1175_v17 }
 0x973   :  { %vm1147_vm3 = vcmp.gt.f32.partialorder %v1141_v18, 0.0  ;;  %v1152_v19 = vmul.f32 0.2, %v1141_v18 }
 0x975   :  { %v1157_v21 = vsel %vm1147_vm3, %v1141_v18, %v1152_v19 }
 0x976   :  { %v1162_v23 = vsub.f32 %v1157_v21, %v1023_v20 }
 0x978   :  { %v1401_v24 = vpop.eup %1400  ;;  %v1171_v25 = vmul.f32 1.442695, %v1162_v23 }
 0x979   :  { %v1176_v29 = vmul.f32 %v1401_v24, %v1052_v22 }
 0x97a   :  { %1402 = vpow2.f32 %v1171_v25 }
 0x97b   :  { %1182 = vst.msk [vmem:[%s1939_s26 + $0x18] sm:$0xff] %vm1178_vm1, %v1176_v29 }
 0x980   :  { %v1403_v30 = vpop.eup %1402 }
 0x981   :  { %v1177_v26 = vmul.f32 %v1403_v30, %v1055_v31 }
 0x983   :  { %1184 = vst.msk [vmem:[%s1939_s26 + $0x20] sm:$0x3f] %vm1183_vm4, %v1177_v26 }
 0x984   :  { %1428 = dma.done.wait [#allocation3], 32  }
 0x985   :  { %1429 = vsyncadd [#allocation3], 4294967264 }
 0x986   :  { %1204 = vsyncpa [#allocation3], 1 }

</bundles_post_ra>
